<compile_context>
chip_gen: v5e
topology: v5e:2x2
jax: 0.10.0
libtpu: 0.0.40
codegen_flags: <defaults>
</compile_context>

<pallas_src>
import functools
import math

import jax
import jax.numpy as jnp
from jax.experimental import pallas as pl
from jax.experimental.pallas import tpu as pltpu

BN_EPS = 1e-5      # nn.BatchNorm1d default eps
NORM_EPS = 1e-12   # F.normalize default eps


# ----------------------------------------------------------------------------
# Fused kernel body: GraphConv stack + fnn_3l head, one batch sample per step
# ----------------------------------------------------------------------------
def _gcnsp_body(num_blocks,
                x_ref, adjh_ref, wf_ref, bf_ref, wb_ref, bb_ref,
                wl_ref, bl_ref, bns_ref, bnt_ref,
                w1r_ref, b1_ref, s1_ref, t1_ref,
                w2_ref, b2_ref, s2_ref, t2_ref,
                w3_ref, b3_ref, emb_ref, yp_ref):
    # ---- invariant loads, hoisted once (outside every loop) -----------------
    adjh = adjh_ref[...]                       # (N, N) = adj + I
    bns = bns_ref[...]                         # (N, 1) eval-BN scale (per node)
    bnt = bnt_ref[...]                         # (N, 1) eval-BN shift (per node)
    wf, bf = wf_ref[...], bf_ref[...]
    wl, bl = wl_ref[...], bl_ref[...]

    def conv(h, w, b):
        # (adj_hat @ h) @ W + b == adj_hat @ (h @ W) + b   (exact reorder)
        z = jnp.dot(h, w, preferred_element_type=jnp.float32)
        return jnp.dot(adjh, z, preferred_element_type=jnp.float32) + b

    def l2_inv(z):
        # 1/max(||z||_2, eps) == rsqrt(max(sum z^2, eps^2)) -> one EUP op
        ss = jnp.sum(z * z, axis=-1, keepdims=True)
        return jax.lax.rsqrt(jnp.maximum(ss, NORM_EPS * NORM_EPS))

    # ---- GraphConv stack (normalize + ReLU + eval-BN fused) -----------------
    h = x_ref[0]                               # (N, Fin)
    z = conv(h, wf, bf)
    h = jnp.maximum(z, 0.0) * (l2_inv(z) * bns) + bnt
    for i in range(num_blocks):
        z = conv(h, wb_ref[i], bb_ref[i])
        h = jnp.maximum(z, 0.0) * (l2_inv(z) * bns) + bnt
    z = conv(h, wl, bl)                        # conv_last: normalize only
    emb = z * l2_inv(z)                        # (N, E)
    emb_ref[0] = emb

    # ---- fnn_3l head, fused into the same kernel ----------------------------
    # flatten(emb) @ W1 == sum_n emb[n,:] @ W1[n*E:(n+1)*E,:].  W1 arrives
    # pre-reshaped host-side to (N, E, nhid), so the sublane->lane flatten is
    # replaced by N tiny MXU accumulations (N=16 -> negligible).
    n_nodes = emb.shape[0]
    h1 = b1_ref[...]                           # (1, nhid)
    for n in range(n_nodes):
        h1 = h1 + jnp.dot(emb[n:n + 1, :], w1r_ref[n],
                          preferred_element_type=jnp.float32)
    h1 = jnp.maximum(h1, 0.0) * s1_ref[...] + t1_ref[...]   # ReLU + eval-BN
    h2 = jnp.dot(h1, w2_ref[...], preferred_element_type=jnp.float32) + b2_ref[...]
    h2 = jnp.maximum(h2, 0.0) * s2_ref[...] + t2_ref[...]
    yp_ref[0] = jnp.dot(h2, w3_ref[...],
                        preferred_element_type=jnp.float32) + b3_ref[...]


def _make_kernel(num_blocks):
    if num_blocks > 0:
        def kernel(x_ref, adjh_ref, wf_ref, bf_ref, wb_ref, bb_ref,
                   wl_ref, bl_ref, bns_ref, bnt_ref,
                   w1r_ref, b1_ref, s1_ref, t1_ref,
                   w2_ref, b2_ref, s2_ref, t2_ref,
                   w3_ref, b3_ref, emb_ref, yp_ref):
            _gcnsp_body(num_blocks, x_ref, adjh_ref, wf_ref, bf_ref, wb_ref,
                        bb_ref, wl_ref, bl_ref, bns_ref, bnt_ref, w1r_ref,
                        b1_ref, s1_ref, t1_ref, w2_ref, b2_ref, s2_ref,
                        t2_ref, w3_ref, b3_ref, emb_ref, yp_ref)
    else:
        def kernel(x_ref, adjh_ref, wf_ref, bf_ref,
                   wl_ref, bl_ref, bns_ref, bnt_ref,
                   w1r_ref, b1_ref, s1_ref, t1_ref,
                   w2_ref, b2_ref, s2_ref, t2_ref,
                   w3_ref, b3_ref, emb_ref, yp_ref):
            _gcnsp_body(0, x_ref, adjh_ref, wf_ref, bf_ref, None, None,
                        wl_ref, bl_ref, bns_ref, bnt_ref, w1r_ref,
                        b1_ref, s1_ref, t1_ref, w2_ref, b2_ref, s2_ref,
                        t2_ref, w3_ref, b3_ref, emb_ref, yp_ref)
    return kernel


# ----------------------------------------------------------------------------
# Wrapper: whole GCNSPnet forward in a single pallas_call
# ----------------------------------------------------------------------------
def gcnsp_forward(x, adj, w_first, b_first, w_blocks, b_blocks, w_last, b_last,
                  bn_scale, bn_shift, w1, b1, s1, t1, w2, b2, s2, t2, w3, b3,
                  *, add_self=True):
    B, N, Fin = x.shape
    H = w_first.shape[1]
    E = w_last.shape[1]
    nhid = w1.shape[1]
    label_dim = w3.shape[1]
    num_blocks = len(w_blocks)

    adjh = adj + jnp.eye(N, dtype=adj.dtype) if add_self else adj
    w1r = w1.reshape(N, E, nhid)          # host-side free reshape of (N*E, nhid)

    def full(shape):                      # whole array resident in VMEM
        nd = len(shape)
        return pl.BlockSpec(shape, lambda b, _nd=nd: (0,) * _nd)

    args = [x, adjh, w_first, b_first.reshape(1, H)]
    in_specs = [pl.BlockSpec((1, N, Fin), lambda b: (b, 0, 0)),
                full((N, N)), full((Fin, H)), full((1, H))]
    if num_blocks:
        wb = jnp.stack(w_blocks)                                   # (NB, H, H)
        bb = jnp.stack([bk.reshape(1, H) for bk in b_blocks])      # (NB, 1, H)
        args += [wb, bb]
        in_specs += [full((num_blocks, H, H)), full((num_blocks, 1, H))]
    args += [w_last, b_last.reshape(1, E), bn_scale, bn_shift,
             w1r, b1.reshape(1, nhid), s1.reshape(1, nhid), t1.reshape(1, nhid),
             w2, b2.reshape(1, nhid), s2.reshape(1, nhid), t2.reshape(1, nhid),
             w3, b3.reshape(1, label_dim)]
    in_specs += [full((H, E)), full((1, E)), full((N, 1)), full((N, 1)),
                 full((N, E, nhid)), full((1, nhid)), full((1, nhid)), full((1, nhid)),
                 full((nhid, nhid)), full((1, nhid)), full((1, nhid)), full((1, nhid)),
                 full((nhid, label_dim)), full((1, label_dim))]

    # advisory cost hint so XLA can overlap this tiny custom call
    flops_per_sample = (2 * N * Fin * H + 2 * N * N * H
                        + num_blocks * (2 * N * H * H + 2 * N * N * H)
                        + 2 * N * H * E + 2 * N * N * E
                        + 2 * N * E * nhid + 2 * nhid * nhid + 2 * nhid * label_dim)
    bytes_accessed = 4 * (sum(int(a.size) for a in args) + B * N * E + B * label_dim)
    cost = pl.CostEstimate(flops=B * flops_per_sample,
                           transcendentals=B * (num_blocks + 2) * N,
                           bytes_accessed=bytes_accessed)

    emb, yp = pl.pallas_call(
        _make_kernel(num_blocks),
        grid=(B,),
        out_shape=(jax.ShapeDtypeStruct((B, N, E), jnp.float32),
                   jax.ShapeDtypeStruct((B, 1, label_dim), jnp.float32)),
        in_specs=in_specs,
        out_specs=(pl.BlockSpec((1, N, E), lambda b: (b, 0, 0)),
                   pl.BlockSpec((1, 1, label_dim), lambda b: (b, 0, 0))),
        compiler_params=pltpu.CompilerParams(
            dimension_semantics=("parallel",)),   # batch across TCs on v7x
        cost_estimate=cost,
    )(*args)
    return yp.reshape(B, label_dim), emb


# ----------------------------------------------------------------------------
# Plain-JAX reference (PyTorch eval-mode semantics, original operation order)
# ----------------------------------------------------------------------------
def gcnsp_ref(x, adj, w_first, b_first, w_blocks, b_blocks, w_last, b_last,
              bn_scale, bn_shift, w1, b1, s1, t1, w2, b2, s2, t2, w3, b3,
              add_self=True):
    def gconv(h, w, b, relu_bn):
        y = jnp.einsum('nm,bmf->bnf', adj, h)
        if add_self:
            y = y + h
        z = jnp.einsum('bnf,fo->bno', y, w) + b
        nrm = jnp.sqrt(jnp.sum(z * z, axis=-1, keepdims=True))
        z = z / jnp.maximum(nrm, NORM_EPS)
        if relu_bn:
            z = jnp.maximum(z, 0.0)
            z = z * bn_scale[None] + bn_shift[None]
        return z

    h = gconv(x, w_first, b_first, True)
    for wbk, bbk in zip(w_blocks, b_blocks):
        h = gconv(h, wbk, bbk, True)
    emb = gconv(h, w_last, b_last, False)
    out = emb.reshape(emb.shape[0], -1)
    hh = jnp.maximum(out @ w1 + b1, 0.0) * s1 + t1
    hh = jnp.maximum(hh @ w2 + b2, 0.0) * s2 + t2
    return hh @ w3 + b3, emb


# ----------------------------------------------------------------------------
# Parameter init (deterministic, mimicking the module's __init__)
# ----------------------------------------------------------------------------
def xavier_uniform(key, shape, gain=1.0):
    fan_in, fan_out = shape
    a = gain * math.sqrt(6.0 / (fan_in + fan_out))
    return jax.random.uniform(key, shape, jnp.float32, -a, a)


if __name__ == "__main__":
    # shapes (roinum must equal input_dim: required by BatchNorm1d(input_dim)
    # applied to the (B, N, H) activations, and by concat=False pred_input_dim)
    B = 2
    input_dim = 16          # == N (num ROIs / nodes)
    hidden_dim = 32
    embedding_dim = 8
    label_dim = 2
    num_layers = 3
    N = input_dim
    nhid = hidden_dim                            # pred_hidden_dims=[] -> hidden_dim
    pred_input_dim = embedding_dim * input_dim   # concat=False path
    add_self = True                              # add_self = not concat

    key = jax.random.PRNGKey(0)
    ks = jax.random.split(key, 20)

    # inputs
    x = jax.random.normal(ks[0], (B, N, input_dim), jnp.float32)
    a = jax.random.uniform(ks[1], (N, N), jnp.float32)
    adj = (a + a.T) * 0.5
    adj = adj / jnp.sum(adj, axis=-1, keepdims=True)      # dense "sparse" adjacency

    # GraphConv params (xavier_uniform with relu gain, bias = 0)
    relu_gain = math.sqrt(2.0)
    w_first = xavier_uniform(ks[2], (input_dim, hidden_dim), relu_gain)
    b_first = jnp.zeros((hidden_dim,), jnp.float32)
    w_blocks, b_blocks = [], []
    for i in range(num_layers - 2):
        w_blocks.append(xavier_uniform(ks[3 + i], (hidden_dim, hidden_dim), relu_gain))
        b_blocks.append(jnp.zeros((hidden_dim,), jnp.float32))
    w_last = xavier_uniform(ks[3 + num_layers - 2], (hidden_dim, embedding_dim), relu_gain)
    b_last = jnp.zeros((embedding_dim,), jnp.float32)

    # apply_bn = BatchNorm1d(input_dim), eval mode, default stats/affine
    bn_scale = jnp.full((N, 1), 1.0 / math.sqrt(1.0 + BN_EPS), jnp.float32)  # gamma/sqrt(var+eps)
    bn_shift = jnp.zeros((N, 1), jnp.float32)                                # beta - mean*scale

    # fnn_3l params
    w1 = xavier_uniform(ks[8], (pred_input_dim, nhid))
    b1 = jax.random.uniform(ks[9], (nhid,), jnp.float32,
                            -1.0 / math.sqrt(pred_input_dim), 1.0 / math.sqrt(pred_input_dim))
    w2 = xavier_uniform(ks[10], (nhid, nhid))
    b2 = jax.random.uniform(ks[11], (nhid,), jnp.float32,
                            -1.0 / math.sqrt(nhid), 1.0 / math.sqrt(nhid))
    w3 = xavier_uniform(ks[12], (nhid, label_dim))
    b3 = jax.random.uniform(ks[13], (label_dim,), jnp.float32,
                            -1.0 / math.sqrt(nhid), 1.0 / math.sqrt(nhid))
    fbn_scale = jnp.full((nhid,), 1.0 / math.sqrt(1.0 + BN_EPS), jnp.float32)
    fbn_shift = jnp.zeros((nhid,), jnp.float32)

    # ------------------------- forward (Pallas, 1 launch) --------------------
    # (torch.max over nodes is appended to out_all but unused when concat=False)
    ypred, x_emb = gcnsp_forward(
        x, adj, w_first, b_first, w_blocks, b_blocks, w_last, b_last,
        bn_scale, bn_shift, w1, b1, fbn_scale, fbn_shift,
        w2, b2, fbn_scale, fbn_shift, w3, b3, add_self=add_self)
    jax.block_until_ready((ypred, x_emb))

    # ------------------------- reference check -------------------------------
    yr, xr = gcnsp_ref(x, adj, w_first, b_first, w_blocks, b_blocks, w_last, b_last,
                       bn_scale, bn_shift, w1, b1, fbn_scale, fbn_shift,
                       w2, b2, fbn_scale, fbn_shift, w3, b3, add_self=add_self)

    assert ypred.shape == (B, label_dim) and x_emb.shape == (B, N, embedding_dim)
    assert jnp.allclose(x_emb, xr, atol=1e-4, rtol=1e-4)
    assert jnp.allclose(ypred, yr, atol=1e-4, rtol=1e-4)
    print("KERNEL_OK")
</pallas_src>

<mosaic_0001>
module attributes {stable_mosaic.version = 11 : i64} {
  func.func @kernel(%arg0: i32, %arg1: memref<1x16x16xf32, #tpu.memory_space<vmem>>, %arg2: memref<16x16xf32, #tpu.memory_space<vmem>>, %arg3: memref<16x32xf32, #tpu.memory_space<vmem>>, %arg4: memref<1x32xf32, #tpu.memory_space<vmem>>, %arg5: memref<1x32x32xf32, #tpu.memory_space<vmem>>, %arg6: memref<1x1x32xf32, #tpu.memory_space<vmem>>, %arg7: memref<32x8xf32, #tpu.memory_space<vmem>>, %arg8: memref<1x8xf32, #tpu.memory_space<vmem>>, %arg9: memref<16x1xf32, #tpu.memory_space<vmem>>, %arg10: memref<16x1xf32, #tpu.memory_space<vmem>>, %arg11: memref<16x8x32xf32, #tpu.memory_space<vmem>>, %arg12: memref<1x32xf32, #tpu.memory_space<vmem>>, %arg13: memref<1x32xf32, #tpu.memory_space<vmem>>, %arg14: memref<1x32xf32, #tpu.memory_space<vmem>>, %arg15: memref<32x32xf32, #tpu.memory_space<vmem>>, %arg16: memref<1x32xf32, #tpu.memory_space<vmem>>, %arg17: memref<1x32xf32, #tpu.memory_space<vmem>>, %arg18: memref<1x32xf32, #tpu.memory_space<vmem>>, %arg19: memref<32x2xf32, #tpu.memory_space<vmem>>, %arg20: memref<1x2xf32, #tpu.memory_space<vmem>>, %arg21: memref<1x16x8xf32, #tpu.memory_space<vmem>>, %arg22: memref<1x1x2xf32, #tpu.memory_space<vmem>>) attributes {dimension_semantics = [#tpu.dimension_semantics<parallel>], iteration_bounds = array<i64: 2>, scalar_prefetch = 0 : i64, scratch_operands = 0 : i64, tpu.core_type = #tpu.core_type<tc>, window_params = [{transform_indices = @transform_0, window_bounds = array<i64: 1, 16, 16>}, {pipeline_mode = #tpu.pipeline_mode<synchronous>, transform_indices = @transform_1, window_bounds = array<i64: 16, 16>}, {pipeline_mode = #tpu.pipeline_mode<synchronous>, transform_indices = @transform_2, window_bounds = array<i64: 16, 32>}, {pipeline_mode = #tpu.pipeline_mode<synchronous>, transform_indices = @transform_3, window_bounds = array<i64: 1, 32>}, {pipeline_mode = #tpu.pipeline_mode<synchronous>, transform_indices = @transform_4, window_bounds = array<i64: 1, 32, 32>}, {pipeline_mode = #tpu.pipeline_mode<synchronous>, transform_indices = @transform_5, window_bounds = array<i64: 1, 1, 32>}, {pipeline_mode = #tpu.pipeline_mode<synchronous>, transform_indices = @transform_6, window_bounds = array<i64: 32, 8>}, {pipeline_mode = #tpu.pipeline_mode<synchronous>, transform_indices = @transform_7, window_bounds = array<i64: 1, 8>}, {pipeline_mode = #tpu.pipeline_mode<synchronous>, transform_indices = @transform_8, window_bounds = array<i64: 16, 1>}, {pipeline_mode = #tpu.pipeline_mode<synchronous>, transform_indices = @transform_9, window_bounds = array<i64: 16, 1>}, {pipeline_mode = #tpu.pipeline_mode<synchronous>, transform_indices = @transform_10, window_bounds = array<i64: 16, 8, 32>}, {pipeline_mode = #tpu.pipeline_mode<synchronous>, transform_indices = @transform_11, window_bounds = array<i64: 1, 32>}, {pipeline_mode = #tpu.pipeline_mode<synchronous>, transform_indices = @transform_12, window_bounds = array<i64: 1, 32>}, {pipeline_mode = #tpu.pipeline_mode<synchronous>, transform_indices = @transform_13, window_bounds = array<i64: 1, 32>}, {pipeline_mode = #tpu.pipeline_mode<synchronous>, transform_indices = @transform_14, window_bounds = array<i64: 32, 32>}, {pipeline_mode = #tpu.pipeline_mode<synchronous>, transform_indices = @transform_15, window_bounds = array<i64: 1, 32>}, {pipeline_mode = #tpu.pipeline_mode<synchronous>, transform_indices = @transform_16, window_bounds = array<i64: 1, 32>}, {pipeline_mode = #tpu.pipeline_mode<synchronous>, transform_indices = @transform_17, window_bounds = array<i64: 1, 32>}, {pipeline_mode = #tpu.pipeline_mode<synchronous>, transform_indices = @transform_18, window_bounds = array<i64: 32, 2>}, {pipeline_mode = #tpu.pipeline_mode<synchronous>, transform_indices = @transform_19, window_bounds = array<i64: 1, 2>}, {transform_indices = @transform_20, window_bounds = array<i64: 1, 16, 8>}, {transform_indices = @transform_21, window_bounds = array<i64: 1, 1, 2>}]} {
    %c0 = arith.constant 0 : index
    %c0_0 = arith.constant 0 : index
    %0 = vector.load %arg2[%c0, %c0_0] : memref<16x16xf32, #tpu.memory_space<vmem>>, vector<16x16xf32>
    %c0_1 = arith.constant 0 : index
    %c0_2 = arith.constant 0 : index
    %1 = vector.load %arg9[%c0_1, %c0_2] : memref<16x1xf32, #tpu.memory_space<vmem>>, vector<16x1xf32>
    %c0_3 = arith.constant 0 : index
    %c0_4 = arith.constant 0 : index
    %2 = vector.load %arg10[%c0_3, %c0_4] : memref<16x1xf32, #tpu.memory_space<vmem>>, vector<16x1xf32>
    %c0_5 = arith.constant 0 : index
    %c0_6 = arith.constant 0 : index
    %3 = vector.load %arg3[%c0_5, %c0_6] : memref<16x32xf32, #tpu.memory_space<vmem>>, vector<16x32xf32>
    %c0_7 = arith.constant 0 : index
    %c0_8 = arith.constant 0 : index
    %4 = vector.load %arg4[%c0_7, %c0_8] : memref<1x32xf32, #tpu.memory_space<vmem>>, vector<1x32xf32>
    %c0_9 = arith.constant 0 : index
    %c0_10 = arith.constant 0 : index
    %5 = vector.load %arg7[%c0_9, %c0_10] : memref<32x8xf32, #tpu.memory_space<vmem>>, vector<32x8xf32>
    %c0_11 = arith.constant 0 : index
    %c0_12 = arith.constant 0 : index
    %6 = vector.load %arg8[%c0_11, %c0_12] : memref<1x8xf32, #tpu.memory_space<vmem>>, vector<1x8xf32>
    %c0_13 = arith.constant 0 : index
    %c0_14 = arith.constant 0 : index
    %c0_15 = arith.constant 0 : index
    %7 = vector.load %arg1[%c0_13, %c0_14, %c0_15] : memref<1x16x16xf32, #tpu.memory_space<vmem>>, vector<1x16x16xf32>
    %8 = vector.shape_cast %7 : vector<1x16x16xf32> to vector<16x16xf32>
    %cst = arith.constant dense<0.000000e+00> : vector<16x32xf32>
    %9 = tpu.matmul %8, %3, %cst {dimension_numbers = #tpu.dot_dimension_numbers<[1], [0], [0], [1], [0, 0, 1, 1], [], []>} : vector<16x16xf32>, vector<16x32xf32>, vector<16x32xf32> -> vector<16x32xf32>
    %cst_16 = arith.constant dense<0.000000e+00> : vector<16x32xf32>
    %10 = tpu.matmul %0, %9, %cst_16 {dimension_numbers = #tpu.dot_dimension_numbers<[1], [0], [0], [1], [0, 0, 1, 1], [], []>} : vector<16x16xf32>, vector<16x32xf32>, vector<16x32xf32> -> vector<16x32xf32>
    %11 = vector.broadcast %4 : vector<1x32xf32> to vector<16x32xf32>
    %12 = arith.addf %10, %11 : vector<16x32xf32>
    %cst_17 = arith.constant 0.000000e+00 : f32
    %13 = vector.broadcast %cst_17 : f32 to vector<16x32xf32>
    %14 = arith.maximumf %12, %13 : vector<16x32xf32>
    %15 = arith.mulf %12, %12 : vector<16x32xf32>
    %cst_18 = arith.constant dense<0.000000e+00> : vector<16xf32>
    %16 = vector.multi_reduction <add>, %15, %cst_18 [1] : vector<16x32xf32> to vector<16xf32>
    %17 = vector.shape_cast %16 : vector<16xf32> to vector<16x1xf32>
    %cst_19 = arith.constant 1.000000e-24 : f32
    %18 = vector.broadcast %cst_19 : f32 to vector<16x1xf32>
    %19 = arith.maximumf %17, %18 : vector<16x1xf32>
    %20 = math.rsqrt %19 : vector<16x1xf32>
    %21 = arith.mulf %20, %1 : vector<16x1xf32>
    %22 = vector.broadcast %21 : vector<16x1xf32> to vector<16x32xf32>
    %23 = arith.mulf %14, %22 : vector<16x32xf32>
    %24 = vector.broadcast %2 : vector<16x1xf32> to vector<16x32xf32>
    %25 = arith.addf %23, %24 : vector<16x32xf32>
    %c0_20 = arith.constant 0 : index
    %c0_21 = arith.constant 0 : index
    %c0_22 = arith.constant 0 : index
    %26 = vector.load %arg5[%c0_20, %c0_21, %c0_22] : memref<1x32x32xf32, #tpu.memory_space<vmem>>, vector<1x32x32xf32>
    %27 = vector.shape_cast %26 : vector<1x32x32xf32> to vector<32x32xf32>
    %c0_23 = arith.constant 0 : index
    %c0_24 = arith.constant 0 : index
    %c0_25 = arith.constant 0 : index
    %28 = vector.load %arg6[%c0_23, %c0_24, %c0_25] : memref<1x1x32xf32, #tpu.memory_space<vmem>>, vector<1x1x32xf32>
    %29 = vector.shape_cast %28 : vector<1x1x32xf32> to vector<1x32xf32>
    %cst_26 = arith.constant dense<0.000000e+00> : vector<16x32xf32>
    %30 = tpu.matmul %25, %27, %cst_26 {dimension_numbers = #tpu.dot_dimension_numbers<[1], [0], [0], [1], [0, 0, 1, 1], [], []>} : vector<16x32xf32>, vector<32x32xf32>, vector<16x32xf32> -> vector<16x32xf32>
    %cst_27 = arith.constant dense<0.000000e+00> : vector<16x32xf32>
    %31 = tpu.matmul %0, %30, %cst_27 {dimension_numbers = #tpu.dot_dimension_numbers<[1], [0], [0], [1], [0, 0, 1, 1], [], []>} : vector<16x16xf32>, vector<16x32xf32>, vector<16x32xf32> -> vector<16x32xf32>
    %32 = vector.broadcast %29 : vector<1x32xf32> to vector<16x32xf32>
    %33 = arith.addf %31, %32 : vector<16x32xf32>
    %cst_28 = arith.constant 0.000000e+00 : f32
    %34 = vector.broadcast %cst_28 : f32 to vector<16x32xf32>
    %35 = arith.maximumf %33, %34 : vector<16x32xf32>
    %36 = arith.mulf %33, %33 : vector<16x32xf32>
    %cst_29 = arith.constant dense<0.000000e+00> : vector<16xf32>
    %37 = vector.multi_reduction <add>, %36, %cst_29 [1] : vector<16x32xf32> to vector<16xf32>
    %38 = vector.shape_cast %37 : vector<16xf32> to vector<16x1xf32>
    %cst_30 = arith.constant 1.000000e-24 : f32
    %39 = vector.broadcast %cst_30 : f32 to vector<16x1xf32>
    %40 = arith.maximumf %38, %39 : vector<16x1xf32>
    %41 = math.rsqrt %40 : vector<16x1xf32>
    %42 = arith.mulf %41, %1 : vector<16x1xf32>
    %43 = vector.broadcast %42 : vector<16x1xf32> to vector<16x32xf32>
    %44 = arith.mulf %35, %43 : vector<16x32xf32>
    %45 = vector.broadcast %2 : vector<16x1xf32> to vector<16x32xf32>
    %46 = arith.addf %44, %45 : vector<16x32xf32>
    %cst_31 = arith.constant dense<0.000000e+00> : vector<16x8xf32>
    %47 = tpu.matmul %46, %5, %cst_31 {dimension_numbers = #tpu.dot_dimension_numbers<[1], [0], [0], [1], [0, 0, 1, 1], [], []>} : vector<16x32xf32>, vector<32x8xf32>, vector<16x8xf32> -> vector<16x8xf32>
    %cst_32 = arith.constant dense<0.000000e+00> : vector<16x8xf32>
    %48 = tpu.matmul %0, %47, %cst_32 {dimension_numbers = #tpu.dot_dimension_numbers<[1], [0], [0], [1], [0, 0, 1, 1], [], []>} : vector<16x16xf32>, vector<16x8xf32>, vector<16x8xf32> -> vector<16x8xf32>
    %49 = vector.broadcast %6 : vector<1x8xf32> to vector<16x8xf32>
    %50 = arith.addf %48, %49 : vector<16x8xf32>
    %51 = arith.mulf %50, %50 : vector<16x8xf32>
    %cst_33 = arith.constant dense<0.000000e+00> : vector<16xf32>
    %52 = vector.multi_reduction <add>, %51, %cst_33 [1] : vector<16x8xf32> to vector<16xf32>
    %53 = vector.shape_cast %52 : vector<16xf32> to vector<16x1xf32>
    %cst_34 = arith.constant 1.000000e-24 : f32
    %54 = vector.broadcast %cst_34 : f32 to vector<16x1xf32>
    %55 = arith.maximumf %53, %54 : vector<16x1xf32>
    %56 = math.rsqrt %55 : vector<16x1xf32>
    %57 = vector.broadcast %56 : vector<16x1xf32> to vector<16x8xf32>
    %58 = arith.mulf %50, %57 : vector<16x8xf32>
    %c0_35 = arith.constant 0 : index
    %c0_36 = arith.constant 0 : index
    %c0_37 = arith.constant 0 : index
    %59 = vector.load %arg21[%c0_35, %c0_36, %c0_37] : memref<1x16x8xf32, #tpu.memory_space<vmem>>, vector<1x16x8xf32>
    %60 = vector.shape_cast %59 : vector<1x16x8xf32> to vector<16x8xf32>
    %61 = vector.shape_cast %58 : vector<16x8xf32> to vector<1x16x8xf32>
    tpu.vector_store %arg21[%c0_35, %c0_36, %c0_37], %61 {strides = array<i32>} : memref<1x16x8xf32, #tpu.memory_space<vmem>>, vector<1x16x8xf32>,
    %c0_38 = arith.constant 0 : index
    %c0_39 = arith.constant 0 : index
    %62 = vector.load %arg12[%c0_38, %c0_39] : memref<1x32xf32, #tpu.memory_space<vmem>>, vector<1x32xf32>
    %63 = vector.extract_strided_slice %58 {offsets = [0, 0], sizes = [1, 8], strides = [1, 1]} : vector<16x8xf32> to vector<1x8xf32>
    %c0_40 = arith.constant 0 : index
    %c0_41 = arith.constant 0 : index
    %c0_42 = arith.constant 0 : index
    %64 = vector.load %arg11[%c0_40, %c0_41, %c0_42] : memref<16x8x32xf32, #tpu.memory_space<vmem>>, vector<1x8x32xf32>
    %65 = vector.shape_cast %64 : vector<1x8x32xf32> to vector<8x32xf32>
    %cst_43 = arith.constant dense<0.000000e+00> : vector<1x32xf32>
    %66 = tpu.matmul %63, %65, %cst_43 {dimension_numbers = #tpu.dot_dimension_numbers<[1], [0], [0], [1], [0, 0, 1, 1], [], []>} : vector<1x8xf32>, vector<8x32xf32>, vector<1x32xf32> -> vector<1x32xf32>
    %67 = arith.addf %62, %66 : vector<1x32xf32>
    %68 = vector.extract_strided_slice %58 {offsets = [1, 0], sizes = [1, 8], strides = [1, 1]} : vector<16x8xf32> to vector<1x8xf32>
    %c1 = arith.constant 1 : index
    %c0_44 = arith.constant 0 : index
    %c0_45 = arith.constant 0 : index
    %69 = vector.load %arg11[%c1, %c0_44, %c0_45] : memref<16x8x32xf32, #tpu.memory_space<vmem>>, vector<1x8x32xf32>
    %70 = vector.shape_cast %69 : vector<1x8x32xf32> to vector<8x32xf32>
    %cst_46 = arith.constant dense<0.000000e+00> : vector<1x32xf32>
    %71 = tpu.matmul %68, %70, %cst_46 {dimension_numbers = #tpu.dot_dimension_numbers<[1], [0], [0], [1], [0, 0, 1, 1], [], []>} : vector<1x8xf32>, vector<8x32xf32>, vector<1x32xf32> -> vector<1x32xf32>
    %72 = arith.addf %67, %71 : vector<1x32xf32>
    %73 = vector.extract_strided_slice %58 {offsets = [2, 0], sizes = [1, 8], strides = [1, 1]} : vector<16x8xf32> to vector<1x8xf32>
    %c2 = arith.constant 2 : index
    %c0_47 = arith.constant 0 : index
    %c0_48 = arith.constant 0 : index
    %74 = vector.load %arg11[%c2, %c0_47, %c0_48] : memref<16x8x32xf32, #tpu.memory_space<vmem>>, vector<1x8x32xf32>
    %75 = vector.shape_cast %74 : vector<1x8x32xf32> to vector<8x32xf32>
    %cst_49 = arith.constant dense<0.000000e+00> : vector<1x32xf32>
    %76 = tpu.matmul %73, %75, %cst_49 {dimension_numbers = #tpu.dot_dimension_numbers<[1], [0], [0], [1], [0, 0, 1, 1], [], []>} : vector<1x8xf32>, vector<8x32xf32>, vector<1x32xf32> -> vector<1x32xf32>
    %77 = arith.addf %72, %76 : vector<1x32xf32>
    %78 = vector.extract_strided_slice %58 {offsets = [3, 0], sizes = [1, 8], strides = [1, 1]} : vector<16x8xf32> to vector<1x8xf32>
    %c3 = arith.constant 3 : index
    %c0_50 = arith.constant 0 : index
    %c0_51 = arith.constant 0 : index
    %79 = vector.load %arg11[%c3, %c0_50, %c0_51] : memref<16x8x32xf32, #tpu.memory_space<vmem>>, vector<1x8x32xf32>
    %80 = vector.shape_cast %79 : vector<1x8x32xf32> to vector<8x32xf32>
    %cst_52 = arith.constant dense<0.000000e+00> : vector<1x32xf32>
    %81 = tpu.matmul %78, %80, %cst_52 {dimension_numbers = #tpu.dot_dimension_numbers<[1], [0], [0], [1], [0, 0, 1, 1], [], []>} : vector<1x8xf32>, vector<8x32xf32>, vector<1x32xf32> -> vector<1x32xf32>
    %82 = arith.addf %77, %81 : vector<1x32xf32>
    %83 = vector.extract_strided_slice %58 {offsets = [4, 0], sizes = [1, 8], strides = [1, 1]} : vector<16x8xf32> to vector<1x8xf32>
    %c4 = arith.constant 4 : index
    %c0_53 = arith.constant 0 : index
    %c0_54 = arith.constant 0 : index
    %84 = vector.load %arg11[%c4, %c0_53, %c0_54] : memref<16x8x32xf32, #tpu.memory_space<vmem>>, vector<1x8x32xf32>
    %85 = vector.shape_cast %84 : vector<1x8x32xf32> to vector<8x32xf32>
    %cst_55 = arith.constant dense<0.000000e+00> : vector<1x32xf32>
    %86 = tpu.matmul %83, %85, %cst_55 {dimension_numbers = #tpu.dot_dimension_numbers<[1], [0], [0], [1], [0, 0, 1, 1], [], []>} : vector<1x8xf32>, vector<8x32xf32>, vector<1x32xf32> -> vector<1x32xf32>
    %87 = arith.addf %82, %86 : vector<1x32xf32>
    %88 = vector.extract_strided_slice %58 {offsets = [5, 0], sizes = [1, 8], strides = [1, 1]} : vector<16x8xf32> to vector<1x8xf32>
    %c5 = arith.constant 5 : index
    %c0_56 = arith.constant 0 : index
    %c0_57 = arith.constant 0 : index
    %89 = vector.load %arg11[%c5, %c0_56, %c0_57] : memref<16x8x32xf32, #tpu.memory_space<vmem>>, vector<1x8x32xf32>
    %90 = vector.shape_cast %89 : vector<1x8x32xf32> to vector<8x32xf32>
    %cst_58 = arith.constant dense<0.000000e+00> : vector<1x32xf32>
    %91 = tpu.matmul %88, %90, %cst_58 {dimension_numbers = #tpu.dot_dimension_numbers<[1], [0], [0], [1], [0, 0, 1, 1], [], []>} : vector<1x8xf32>, vector<8x32xf32>, vector<1x32xf32> -> vector<1x32xf32>
    %92 = arith.addf %87, %91 : vector<1x32xf32>
    %93 = vector.extract_strided_slice %58 {offsets = [6, 0], sizes = [1, 8], strides = [1, 1]} : vector<16x8xf32> to vector<1x8xf32>
    %c6 = arith.constant 6 : index
    %c0_59 = arith.constant 0 : index
    %c0_60 = arith.constant 0 : index
    %94 = vector.load %arg11[%c6, %c0_59, %c0_60] : memref<16x8x32xf32, #tpu.memory_space<vmem>>, vector<1x8x32xf32>
    %95 = vector.shape_cast %94 : vector<1x8x32xf32> to vector<8x32xf32>
    %cst_61 = arith.constant dense<0.000000e+00> : vector<1x32xf32>
    %96 = tpu.matmul %93, %95, %cst_61 {dimension_numbers = #tpu.dot_dimension_numbers<[1], [0], [0], [1], [0, 0, 1, 1], [], []>} : vector<1x8xf32>, vector<8x32xf32>, vector<1x32xf32> -> vector<1x32xf32>
    %97 = arith.addf %92, %96 : vector<1x32xf32>
    %98 = vector.extract_strided_slice %58 {offsets = [7, 0], sizes = [1, 8], strides = [1, 1]} : vector<16x8xf32> to vector<1x8xf32>
    %c7 = arith.constant 7 : index
    %c0_62 = arith.constant 0 : index
    %c0_63 = arith.constant 0 : index
    %99 = vector.load %arg11[%c7, %c0_62, %c0_63] : memref<16x8x32xf32, #tpu.memory_space<vmem>>, vector<1x8x32xf32>
    %100 = vector.shape_cast %99 : vector<1x8x32xf32> to vector<8x32xf32>
    %cst_64 = arith.constant dense<0.000000e+00> : vector<1x32xf32>
    %101 = tpu.matmul %98, %100, %cst_64 {dimension_numbers = #tpu.dot_dimension_numbers<[1], [0], [0], [1], [0, 0, 1, 1], [], []>} : vector<1x8xf32>, vector<8x32xf32>, vector<1x32xf32> -> vector<1x32xf32>
    %102 = arith.addf %97, %101 : vector<1x32xf32>
    %103 = vector.extract_strided_slice %58 {offsets = [8, 0], sizes = [1, 8], strides = [1, 1]} : vector<16x8xf32> to vector<1x8xf32>
    %c8 = arith.constant 8 : index
    %c0_65 = arith.constant 0 : index
    %c0_66 = arith.constant 0 : index
    %104 = vector.load %arg11[%c8, %c0_65, %c0_66] : memref<16x8x32xf32, #tpu.memory_space<vmem>>, vector<1x8x32xf32>
    %105 = vector.shape_cast %104 : vector<1x8x32xf32> to vector<8x32xf32>
    %cst_67 = arith.constant dense<0.000000e+00> : vector<1x32xf32>
    %106 = tpu.matmul %103, %105, %cst_67 {dimension_numbers = #tpu.dot_dimension_numbers<[1], [0], [0], [1], [0, 0, 1, 1], [], []>} : vector<1x8xf32>, vector<8x32xf32>, vector<1x32xf32> -> vector<1x32xf32>
    %107 = arith.addf %102, %106 : vector<1x32xf32>
    %108 = vector.extract_strided_slice %58 {offsets = [9, 0], sizes = [1, 8], strides = [1, 1]} : vector<16x8xf32> to vector<1x8xf32>
    %c9 = arith.constant 9 : index
    %c0_68 = arith.constant 0 : index
    %c0_69 = arith.constant 0 : index
    %109 = vector.load %arg11[%c9, %c0_68, %c0_69] : memref<16x8x32xf32, #tpu.memory_space<vmem>>, vector<1x8x32xf32>
    %110 = vector.shape_cast %109 : vector<1x8x32xf32> to vector<8x32xf32>
    %cst_70 = arith.constant dense<0.000000e+00> : vector<1x32xf32>
    %111 = tpu.matmul %108, %110, %cst_70 {dimension_numbers = #tpu.dot_dimension_numbers<[1], [0], [0], [1], [0, 0, 1, 1], [], []>} : vector<1x8xf32>, vector<8x32xf32>, vector<1x32xf32> -> vector<1x32xf32>
    %112 = arith.addf %107, %111 : vector<1x32xf32>
    %113 = vector.extract_strided_slice %58 {offsets = [10, 0], sizes = [1, 8], strides = [1, 1]} : vector<16x8xf32> to vector<1x8xf32>
    %c10 = arith.constant 10 : index
    %c0_71 = arith.constant 0 : index
    %c0_72 = arith.constant 0 : index
    %114 = vector.load %arg11[%c10, %c0_71, %c0_72] : memref<16x8x32xf32, #tpu.memory_space<vmem>>, vector<1x8x32xf32>
    %115 = vector.shape_cast %114 : vector<1x8x32xf32> to vector<8x32xf32>
    %cst_73 = arith.constant dense<0.000000e+00> : vector<1x32xf32>
    %116 = tpu.matmul %113, %115, %cst_73 {dimension_numbers = #tpu.dot_dimension_numbers<[1], [0], [0], [1], [0, 0, 1, 1], [], []>} : vector<1x8xf32>, vector<8x32xf32>, vector<1x32xf32> -> vector<1x32xf32>
    %117 = arith.addf %112, %116 : vector<1x32xf32>
    %118 = vector.extract_strided_slice %58 {offsets = [11, 0], sizes = [1, 8], strides = [1, 1]} : vector<16x8xf32> to vector<1x8xf32>
    %c11 = arith.constant 11 : index
    %c0_74 = arith.constant 0 : index
    %c0_75 = arith.constant 0 : index
    %119 = vector.load %arg11[%c11, %c0_74, %c0_75] : memref<16x8x32xf32, #tpu.memory_space<vmem>>, vector<1x8x32xf32>
    %120 = vector.shape_cast %119 : vector<1x8x32xf32> to vector<8x32xf32>
    %cst_76 = arith.constant dense<0.000000e+00> : vector<1x32xf32>
    %121 = tpu.matmul %118, %120, %cst_76 {dimension_numbers = #tpu.dot_dimension_numbers<[1], [0], [0], [1], [0, 0, 1, 1], [], []>} : vector<1x8xf32>, vector<8x32xf32>, vector<1x32xf32> -> vector<1x32xf32>
    %122 = arith.addf %117, %121 : vector<1x32xf32>
    %123 = vector.extract_strided_slice %58 {offsets = [12, 0], sizes = [1, 8], strides = [1, 1]} : vector<16x8xf32> to vector<1x8xf32>
    %c12 = arith.constant 12 : index
    %c0_77 = arith.constant 0 : index
    %c0_78 = arith.constant 0 : index
    %124 = vector.load %arg11[%c12, %c0_77, %c0_78] : memref<16x8x32xf32, #tpu.memory_space<vmem>>, vector<1x8x32xf32>
    %125 = vector.shape_cast %124 : vector<1x8x32xf32> to vector<8x32xf32>
    %cst_79 = arith.constant dense<0.000000e+00> : vector<1x32xf32>
    %126 = tpu.matmul %123, %125, %cst_79 {dimension_numbers = #tpu.dot_dimension_numbers<[1], [0], [0], [1], [0, 0, 1, 1], [], []>} : vector<1x8xf32>, vector<8x32xf32>, vector<1x32xf32> -> vector<1x32xf32>
    %127 = arith.addf %122, %126 : vector<1x32xf32>
    %128 = vector.extract_strided_slice %58 {offsets = [13, 0], sizes = [1, 8], strides = [1, 1]} : vector<16x8xf32> to vector<1x8xf32>
    %c13 = arith.constant 13 : index
    %c0_80 = arith.constant 0 : index
    %c0_81 = arith.constant 0 : index
    %129 = vector.load %arg11[%c13, %c0_80, %c0_81] : memref<16x8x32xf32, #tpu.memory_space<vmem>>, vector<1x8x32xf32>
    %130 = vector.shape_cast %129 : vector<1x8x32xf32> to vector<8x32xf32>
    %cst_82 = arith.constant dense<0.000000e+00> : vector<1x32xf32>
    %131 = tpu.matmul %128, %130, %cst_82 {dimension_numbers = #tpu.dot_dimension_numbers<[1], [0], [0], [1], [0, 0, 1, 1], [], []>} : vector<1x8xf32>, vector<8x32xf32>, vector<1x32xf32> -> vector<1x32xf32>
    %132 = arith.addf %127, %131 : vector<1x32xf32>
    %133 = vector.extract_strided_slice %58 {offsets = [14, 0], sizes = [1, 8], strides = [1, 1]} : vector<16x8xf32> to vector<1x8xf32>
    %c14 = arith.constant 14 : index
    %c0_83 = arith.constant 0 : index
    %c0_84 = arith.constant 0 : index
    %134 = vector.load %arg11[%c14, %c0_83, %c0_84] : memref<16x8x32xf32, #tpu.memory_space<vmem>>, vector<1x8x32xf32>
    %135 = vector.shape_cast %134 : vector<1x8x32xf32> to vector<8x32xf32>
    %cst_85 = arith.constant dense<0.000000e+00> : vector<1x32xf32>
    %136 = tpu.matmul %133, %135, %cst_85 {dimension_numbers = #tpu.dot_dimension_numbers<[1], [0], [0], [1], [0, 0, 1, 1], [], []>} : vector<1x8xf32>, vector<8x32xf32>, vector<1x32xf32> -> vector<1x32xf32>
    %137 = arith.addf %132, %136 : vector<1x32xf32>
    %138 = vector.extract_strided_slice %58 {offsets = [15, 0], sizes = [1, 8], strides = [1, 1]} : vector<16x8xf32> to vector<1x8xf32>
    %c15 = arith.constant 15 : index
    %c0_86 = arith.constant 0 : index
    %c0_87 = arith.constant 0 : index
    %139 = vector.load %arg11[%c15, %c0_86, %c0_87] : memref<16x8x32xf32, #tpu.memory_space<vmem>>, vector<1x8x32xf32>
    %140 = vector.shape_cast %139 : vector<1x8x32xf32> to vector<8x32xf32>
    %cst_88 = arith.constant dense<0.000000e+00> : vector<1x32xf32>
    %141 = tpu.matmul %138, %140, %cst_88 {dimension_numbers = #tpu.dot_dimension_numbers<[1], [0], [0], [1], [0, 0, 1, 1], [], []>} : vector<1x8xf32>, vector<8x32xf32>, vector<1x32xf32> -> vector<1x32xf32>
    %142 = arith.addf %137, %141 : vector<1x32xf32>
    %cst_89 = arith.constant 0.000000e+00 : f32
    %143 = vector.broadcast %cst_89 : f32 to vector<1x32xf32>
    %144 = arith.maximumf %142, %143 : vector<1x32xf32>
    %c0_90 = arith.constant 0 : index
    %c0_91 = arith.constant 0 : index
    %145 = vector.load %arg13[%c0_90, %c0_91] : memref<1x32xf32, #tpu.memory_space<vmem>>, vector<1x32xf32>
    %146 = arith.mulf %144, %145 : vector<1x32xf32>
    %c0_92 = arith.constant 0 : index
    %c0_93 = arith.constant 0 : index
    %147 = vector.load %arg14[%c0_92, %c0_93] : memref<1x32xf32, #tpu.memory_space<vmem>>, vector<1x32xf32>
    %148 = arith.addf %146, %147 : vector<1x32xf32>
    %c0_94 = arith.constant 0 : index
    %c0_95 = arith.constant 0 : index
    %149 = vector.load %arg15[%c0_94, %c0_95] : memref<32x32xf32, #tpu.memory_space<vmem>>, vector<32x32xf32>
    %cst_96 = arith.constant dense<0.000000e+00> : vector<1x32xf32>
    %150 = tpu.matmul %148, %149, %cst_96 {dimension_numbers = #tpu.dot_dimension_numbers<[1], [0], [0], [1], [0, 0, 1, 1], [], []>} : vector<1x32xf32>, vector<32x32xf32>, vector<1x32xf32> -> vector<1x32xf32>
    %c0_97 = arith.constant 0 : index
    %c0_98 = arith.constant 0 : index
    %151 = vector.load %arg16[%c0_97, %c0_98] : memref<1x32xf32, #tpu.memory_space<vmem>>, vector<1x32xf32>
    %152 = arith.addf %150, %151 : vector<1x32xf32>
    %cst_99 = arith.constant 0.000000e+00 : f32
    %153 = vector.broadcast %cst_99 : f32 to vector<1x32xf32>
    %154 = arith.maximumf %152, %153 : vector<1x32xf32>
    %c0_100 = arith.constant 0 : index
    %c0_101 = arith.constant 0 : index
    %155 = vector.load %arg17[%c0_100, %c0_101] : memref<1x32xf32, #tpu.memory_space<vmem>>, vector<1x32xf32>
    %156 = arith.mulf %154, %155 : vector<1x32xf32>
    %c0_102 = arith.constant 0 : index
    %c0_103 = arith.constant 0 : index
    %157 = vector.load %arg18[%c0_102, %c0_103] : memref<1x32xf32, #tpu.memory_space<vmem>>, vector<1x32xf32>
    %158 = arith.addf %156, %157 : vector<1x32xf32>
    %c0_104 = arith.constant 0 : index
    %c0_105 = arith.constant 0 : index
    %159 = vector.load %arg19[%c0_104, %c0_105] : memref<32x2xf32, #tpu.memory_space<vmem>>, vector<32x2xf32>
    %cst_106 = arith.constant dense<0.000000e+00> : vector<1x2xf32>
    %160 = tpu.matmul %158, %159, %cst_106 {dimension_numbers = #tpu.dot_dimension_numbers<[1], [0], [0], [1], [0, 0, 1, 1], [], []>} : vector<1x32xf32>, vector<32x2xf32>, vector<1x2xf32> -> vector<1x2xf32>
    %c0_107 = arith.constant 0 : index
    %c0_108 = arith.constant 0 : index
    %161 = vector.load %arg20[%c0_107, %c0_108] : memref<1x2xf32, #tpu.memory_space<vmem>>, vector<1x2xf32>
    %162 = arith.addf %160, %161 : vector<1x2xf32>
    %c0_109 = arith.constant 0 : index
    %c0_110 = arith.constant 0 : index
    %c0_111 = arith.constant 0 : index
    %163 = vector.load %arg22[%c0_109, %c0_110, %c0_111] : memref<1x1x2xf32, #tpu.memory_space<vmem>>, vector<1x1x2xf32>
    %164 = vector.shape_cast %163 : vector<1x1x2xf32> to vector<1x2xf32>
    %165 = vector.shape_cast %162 : vector<1x2xf32> to vector<1x1x2xf32>
    tpu.vector_store %arg22[%c0_109, %c0_110, %c0_111], %165 {strides = array<i32>} : memref<1x1x2xf32, #tpu.memory_space<vmem>>, vector<1x1x2xf32>,
    return
  }
  func.func @transform_0(%arg0: i32) -> (i32, i32, i32) {
    %c0_i32 = arith.constant 0 : i32
    %c0_i32_0 = arith.constant 0 : i32
    %c0_i32_1 = arith.constant 0 : i32
    return %arg0, %c0_i32, %c0_i32_0 : i32, i32, i32
  }
  func.func @transform_1(%arg0: i32) -> (i32, i32) {
    %c0_i32 = arith.constant 0 : i32
    %c0_i32_0 = arith.constant 0 : i32
    %c0_i32_1 = arith.constant 0 : i32
    return %c0_i32, %c0_i32_0 : i32, i32
  }
  func.func @transform_2(%arg0: i32) -> (i32, i32) {
    %c0_i32 = arith.constant 0 : i32
    %c0_i32_0 = arith.constant 0 : i32
    %c0_i32_1 = arith.constant 0 : i32
    return %c0_i32, %c0_i32_0 : i32, i32
  }
  func.func @transform_3(%arg0: i32) -> (i32, i32) {
    %c0_i32 = arith.constant 0 : i32
    %c0_i32_0 = arith.constant 0 : i32
    %c0_i32_1 = arith.constant 0 : i32
    return %c0_i32, %c0_i32_0 : i32, i32
  }
  func.func @transform_4(%arg0: i32) -> (i32, i32, i32) {
    %c0_i32 = arith.constant 0 : i32
    %c0_i32_0 = arith.constant 0 : i32
    %c0_i32_1 = arith.constant 0 : i32
    %c0_i32_2 = arith.constant 0 : i32
    return %c0_i32, %c0_i32_0, %c0_i32_1 : i32, i32, i32
  }
  func.func @transform_5(%arg0: i32) -> (i32, i32, i32) {
    %c0_i32 = arith.constant 0 : i32
    %c0_i32_0 = arith.constant 0 : i32
    %c0_i32_1 = arith.constant 0 : i32
    %c0_i32_2 = arith.constant 0 : i32
    return %c0_i32, %c0_i32_0, %c0_i32_1 : i32, i32, i32
  }
  func.func @transform_6(%arg0: i32) -> (i32, i32) {
    %c0_i32 = arith.constant 0 : i32
    %c0_i32_0 = arith.constant 0 : i32
    %c0_i32_1 = arith.constant 0 : i32
    return %c0_i32, %c0_i32_0 : i32, i32
  }
  func.func @transform_7(%arg0: i32) -> (i32, i32) {
    %c0_i32 = arith.constant 0 : i32
    %c0_i32_0 = arith.constant 0 : i32
    %c0_i32_1 = arith.constant 0 : i32
    return %c0_i32, %c0_i32_0 : i32, i32
  }
  func.func @transform_8(%arg0: i32) -> (i32, i32) {
    %c0_i32 = arith.constant 0 : i32
    %c0_i32_0 = arith.constant 0 : i32
    %c0_i32_1 = arith.constant 0 : i32
    return %c0_i32, %c0_i32_0 : i32, i32
  }
  func.func @transform_9(%arg0: i32) -> (i32, i32) {
    %c0_i32 = arith.constant 0 : i32
    %c0_i32_0 = arith.constant 0 : i32
    %c0_i32_1 = arith.constant 0 : i32
    return %c0_i32, %c0_i32_0 : i32, i32
  }
  func.func @transform_10(%arg0: i32) -> (i32, i32, i32) {
    %c0_i32 = arith.constant 0 : i32
    %c0_i32_0 = arith.constant 0 : i32
    %c0_i32_1 = arith.constant 0 : i32
    %c0_i32_2 = arith.constant 0 : i32
    return %c0_i32, %c0_i32_0, %c0_i32_1 : i32, i32, i32
  }
  func.func @transform_11(%arg0: i32) -> (i32, i32) {
    %c0_i32 = arith.constant 0 : i32
    %c0_i32_0 = arith.constant 0 : i32
    %c0_i32_1 = arith.constant 0 : i32
    return %c0_i32, %c0_i32_0 : i32, i32
  }
  func.func @transform_12(%arg0: i32) -> (i32, i32) {
    %c0_i32 = arith.constant 0 : i32
    %c0_i32_0 = arith.constant 0 : i32
    %c0_i32_1 = arith.constant 0 : i32
    return %c0_i32, %c0_i32_0 : i32, i32
  }
  func.func @transform_13(%arg0: i32) -> (i32, i32) {
    %c0_i32 = arith.constant 0 : i32
    %c0_i32_0 = arith.constant 0 : i32
    %c0_i32_1 = arith.constant 0 : i32
    return %c0_i32, %c0_i32_0 : i32, i32
  }
  func.func @transform_14(%arg0: i32) -> (i32, i32) {
    %c0_i32 = arith.constant 0 : i32
    %c0_i32_0 = arith.constant 0 : i32
    %c0_i32_1 = arith.constant 0 : i32
    return %c0_i32, %c0_i32_0 : i32, i32
  }
  func.func @transform_15(%arg0: i32) -> (i32, i32) {
    %c0_i32 = arith.constant 0 : i32
    %c0_i32_0 = arith.constant 0 : i32
    %c0_i32_1 = arith.constant 0 : i32
    return %c0_i32, %c0_i32_0 : i32, i32
  }
  func.func @transform_16(%arg0: i32) -> (i32, i32) {
    %c0_i32 = arith.constant 0 : i32
    %c0_i32_0 = arith.constant 0 : i32
    %c0_i32_1 = arith.constant 0 : i32
    return %c0_i32, %c0_i32_0 : i32, i32
  }
  func.func @transform_17(%arg0: i32) -> (i32, i32) {
    %c0_i32 = arith.constant 0 : i32
    %c0_i32_0 = arith.constant 0 : i32
    %c0_i32_1 = arith.constant 0 : i32
    return %c0_i32, %c0_i32_0 : i32, i32
  }
  func.func @transform_18(%arg0: i32) -> (i32, i32) {
    %c0_i32 = arith.constant 0 : i32
    %c0_i32_0 = arith.constant 0 : i32
    %c0_i32_1 = arith.constant 0 : i32
    return %c0_i32, %c0_i32_0 : i32, i32
  }
  func.func @transform_19(%arg0: i32) -> (i32, i32) {
    %c0_i32 = arith.constant 0 : i32
    %c0_i32_0 = arith.constant 0 : i32
    %c0_i32_1 = arith.constant 0 : i32
    return %c0_i32, %c0_i32_0 : i32, i32
  }
  func.func @transform_20(%arg0: i32) -> (i32, i32, i32) {
    %c0_i32 = arith.constant 0 : i32
    %c0_i32_0 = arith.constant 0 : i32
    %c0_i32_1 = arith.constant 0 : i32
    return %arg0, %c0_i32, %c0_i32_0 : i32, i32, i32
  }
  func.func @transform_21(%arg0: i32) -> (i32, i32, i32) {
    %c0_i32 = arith.constant 0 : i32
    %c0_i32_0 = arith.constant 0 : i32
    %c0_i32_1 = arith.constant 0 : i32
    return %arg0, %c0_i32, %c0_i32_0 : i32, i32, i32
  }
}

</mosaic_0001>

<bundles_post_ra>
// kernel: tpu_custom_call.1
= control target key start
LH: loop header
LB: loop body
LE: loop exit
PB: predicated region body
PF: predicated region fallthrough
CT: control target
= control target key end

     0   :  { %s2377_s0 = inlined_call_operand.vmem [shape: f32[2,16,16], index: 0, kind: input, shape index: {}]   ;;  %s2378_s1 = inlined_call_operand.hbm [shape: f32[16,16], index: 1, kind: input, shape index: {}]   ;;  %s2379_s2 = inlined_call_operand.hbm [shape: f32[16,32], index: 2, kind: input, shape index: {}]   ;;  %s2380_s3 = inlined_call_operand.vmem [shape: f32[1,32], index: 3, kind: input, shape index: {}]   ;;  %s2381_s4 = inlined_call_operand.vmem [shape: f32[1,32,32], index: 4, kind: input, shape index: {}]   ;;  %s2382_s5 = inlined_call_operand.vmem [shape: f32[1,1,32], index: 5, kind: input, shape index: {}]   ;;  %s2383_s6 = inlined_call_operand.vmem [shape: f32[32,8], index: 6, kind: input, shape index: {}]   ;;  %s2384_s7 = inlined_call_operand.vmem [shape: f32[1,8], index: 7, kind: input, shape index: {}]   ;;  %s2385_s8 = inlined_call_operand.vmem [shape: f32[16,1], index: 8, kind: input, shape index: {}]   ;;  %s2386_s9 = inlined_call_operand.vmem [shape: f32[16,1], index: 9, kind: input, shape index: {}]   ;;  %s2387_s10 = inlined_call_operand.hbm [shape: f32[16,8,32], index: 10, kind: input, shape index: {}]   ;;  %s2388_s11 = inlined_call_operand.vmem [shape: f32[1,32], index: 11, kind: input, shape index: {}]   ;;  %s2389_s12 = inlined_call_operand.vmem [shape: f32[1,32], index: 12, kind: input, shape index: {}]   ;;  %s2390_s13 = inlined_call_operand.vmem [shape: f32[1,32], index: 13, kind: input, shape index: {}]   ;;  %s2391_s14 = inlined_call_operand.vmem [shape: f32[32,32], index: 14, kind: input, shape index: {}]   ;;  %s2392_s15 = inlined_call_operand.vmem [shape: f32[1,32], index: 15, kind: input, shape index: {}]   ;;  %s2393_s16 = inlined_call_operand.vmem [shape: f32[1,32], index: 16, kind: input, shape index: {}]   ;;  %s2394_s17 = inlined_call_operand.vmem [shape: f32[1,32], index: 17, kind: input, shape index: {}]   ;;  %s2395_s18 = inlined_call_operand.vmem [shape: f32[32,2], index: 18, kind: input, shape index: {}]   ;;  %s2396_s19 = inlined_call_operand.vmem [shape: f32[1,2], index: 19, kind: input, shape index: {}]   ;;  %s2397_s20 = inlined_call_operand.vmem [shape: f32[2,16,8], index: 20, kind: output, shape index: {0}]   ;;  %s2398_s21 = inlined_call_operand.hbm [shape: f32[2,1,2], index: 21, kind: output, shape index: {1}]  }
   0x1   :  { %2409 = sst [smem:[#allocation19_spill]] %s2377_s0 }
   0x2   :  { %2410 = sst [smem:[#allocation20_spill]] %s2378_s1 }
   0x3   :  { %2411 = sst [smem:[#allocation21_spill]] %s2379_s2 }
   0x4   :  { %2412 = sst [smem:[#allocation22_spill]] %s2380_s3 }
   0x5   :  { %2413 = sst [smem:[#allocation23_spill]] %s2381_s4 }
   0x6   :  { %2414 = sst [smem:[#allocation24_spill]] %s2382_s5 }
   0x7   :  { %2415 = sst [smem:[#allocation25_spill]] %s2383_s6 }
   0x8   :  { %2416 = sst [smem:[#allocation26_spill]] %s2396_s19 }
   0x9   :  { %2417 = sst [smem:[#allocation27_spill]] %s2398_s21 }
   0xa   :  { %27 = vsyncpa [#allocation3], 0 }
   0xb   :  { %28 = vsyncpa [#allocation6], 0 }
   0xc   :  { %29 = vsyncpa [#allocation4], 0 }
   0xd   :  { %31 = vsyncpa [#allocation4 + $0x1], 0  ;;  %s2085_s2 = smov 0   ;;  %s2087_s25 = smov 0  }
   0xe   :  { %s2089_s26 = smov 0   ;;  %s2091_s27 = smov 0  }
   0xf LB: > { %2418 = sst [smem:[#allocation12_spill]] %s1955_s2  ;;  %s2106_s3 = sadd.s32 4294967295, %s1967_s27   ;;  %s1967_s27 = sphi %s2091_s27, %s2442_s27   ;;  %s1963_s26 = sphi %s2089_s26, %s2444_s26   ;;  %s1959_s25 = sphi %s2087_s25, %s2446_s25   ;;  %s1955_s2 = sphi %s2085_s2, %s2445_s2  }
  0x10   : > { %2419 = sst [smem:[#allocation13_spill]] %s1963_s26  ;;  %s1668_s28 = sadd.s32 4294967294, %s1967_s27  }
  0x11   : > { %2420 = sst [smem:[#allocation14_spill]] %s1967_s27  ;;  %s2110_s29 = sadd.s32 1, %s1967_s27  }
  0x12   : > { %2421 = sst [smem:[#allocation15_spill]] %s2110_s29  ;;  %s495_s0 = sadd.s32 1, %s1963_s26 }
  0x13   : > { %s492_s4 = ssub.s32 %s1967_s27, %s2110_s29  ;;  %p505_p0 = scmp.ne.s32.totalorder %s1963_s26, %s1959_s25 }
  0x14   : > { %p493_p1 = scmp.eq.s32.totalorder %s492_s4, 0  ;;  %p506_p2 = scmp.eq.s32.totalorder %s2106_s3, 1 }
  0x15   : > { %p511_p3 = scmp.ne.s32.totalorder %s1959_s25, %s1955_s2  ;;  %p512_p4 = scmp.eq.s32.totalorder %s1668_s28, 1 }
  0x16   : > { %s2121_s30 = scalar_select %p493_p1, %s1963_s26, %s495_s0  }
  0x17   : > { %p2123_p5 = por %p506_p2, %p505_p0  ;;  %p2127_p6 = por %p512_p4, %p511_p3 }
  0x18   : > { %2422 = sst [smem:[#allocation16_spill]] %s2121_s30  ;;  %p1669_p7 = scmp.ge.s32.totalorder %s1967_s27, 1 }
  0x19   : > { %s2423_s5 = scalar_select %p2123_p5, 1, 0 }
  0x1a   : > { %s2425_s22 = scalar_select %p2127_p6, 1, 0 }
  0x1b   : > { %2424 = sst [smem:[#allocation17_spill]] %s2423_s5  ;;  %p519_p8 = scmp.lt.s32.totalorder %s1967_s27, 3 }
  0x1c   : > { %2426 = sst [smem:[#allocation18_spill]] %s2425_s22  ;;  %p1744_p9 = scmp.eq.s32.totalorder %s2106_s3, 0 }
  0x1d   : > { %p2134_p10 = pnand %p1669_p7, %p519_p8  ;;  %s2428_s28 = sld [smem:[#allocation21_spill]] }
  0x1e   : > { %s2429_s26 = sld [smem:[#allocation20_spill]]  ;;  %s1969_s2 = smov [#allocation5]  }
  0x1f   : > { %p1730_p11 = pneg %p2134_p10  ;;  %s546_s27 = sshll.u32 %s1969_s2, 4  ;;  %s547_s27 = int_to_ptr.vmem [resolvable:$true] %s546_s27 }
  0x20   : > { %s1970_s1 = smov 128   ;;  %s1971_s24 = smov 8  }
  0x21   : > { %p2148_p12 = pnand %p1744_p9, %p1730_p11  ;;  %s579_s4 = sshll.u32 %s2387_s10, 4  ;;  %s580_s4 = int_to_ptr.hbm [resolvable:$true] %s579_s4 }
  0x22   : > { %s1973_s19 = smov [#allocation7]  }
  0x23   : > { %s544_s0 = sshll.u32 %s2428_s28, 4  ;;  %s1972_s28 = smov [#allocation2]   ;;  %s545_s0 = int_to_ptr.hbm [resolvable:$true] %s544_s0 }
  0x24   : > { %s530_s29 = sshll.u32 %s2429_s26, 4  ;;  %s532_s5 = sshll.u32 %s1972_s28, 4  ;;  %s531_s29 = int_to_ptr.hbm [resolvable:$true] %s530_s29  ;;  %s533_s5 = int_to_ptr.vmem [resolvable:$true] %s532_s5 }
  0x25   : > { %1736 = dma.hbm_to_vmem [thread:$0]  (!%p2148_p12), %s545_s0, 256, %s547_s27, [#allocation6], %s1970_s1, %s1970_s1, %s1971_s24  }
  0x26   : > { %1733 = dma.hbm_to_vmem [thread:$0]  (!%p2148_p12), %s531_s29, 256, %s533_s5, [#allocation3], %s1970_s1, %s1970_s1, %s1971_s24  }
  0x27   : > { %s581_s21 = sshll.u32 %s1973_s19, 4  ;;  %632 = sbr.rel (%p2134_p10) target bundleno = 1968 (0x7b0), region = 100  ;;  %s582_s21 = int_to_ptr.vmem [resolvable:$true] %s581_s21 }
  0x28   : > { %1739 = dma.hbm_to_vmem [thread:$0]  (!%p2148_p12), %s580_s4, 2048, %s582_s21, [#allocation6], %s1970_s1, %s1970_s1, %s1971_s24  }
  0x2c   : > { %1942 = dma.done.wait (%p1744_p9), [#allocation3], 256  }
  0x2d   : > { %1944 = vsyncadd (%p1744_p9), [#allocation3], 4294967040 }
  0x2e   : > { %1946 = dma.done.wait (%p1744_p9), [#allocation6], 2304  }
  0x2f   : > { %1948 = vsyncadd (%p1744_p9), [#allocation6], 4294964992  ;;  %p707_p13 = scmp.lt.s32.totalorder %s2106_s3, 1  ;;  %s2431_s29 = sld [smem:[#allocation19_spill]]  ;;  %v724_v0 = vld [vmem:[#allocation5 + $0x8] sm:$0xff]  ;;  %v723_v1 = vld [vmem:[#allocation5] sm:$0xff] }
  0x30   : > { %754 = vmatpush.msra.mxu0 %v724_v0  ;;  %vm733_vm0 = vcmask 130048   ;;  %v2183_v6 = vld [vmem:[#allocation2] sm:$0xff]  ;;  %v2187_v7 = vld [vmem:[#allocation2 + $0x8] sm:$0xff]  ;;  %s2432_s0 = sld [smem:[#allocation22_spill]]  ;;  %vm799_vm1 = vcmask 261120   ;;  %v1974_v17 = vmov 0  }
  0x31   : > { %s2173_s19 = scalar_select %p707_p13, %s2106_s3, 1  ;;  %1789 = vset.pattern.permute.xlu1 %v1974_v17  ;;  %1790 = vset.pattern.permute.xlu2 %v1974_v17  ;;  %v2199_v29 = vld [vmem:[%s2385_s8] sm:$0xff]  ;;  %v2205_v36 = vld [vmem:[%s2385_s8 + $0x8] sm:$0xff]  ;;  %vm1019_vm14 = vcmask 64512  }
  0x32   : > { %755 = vmatpush.msra.mxu0 %v723_v1  ;;  %1791 = vset.pattern.permute.xlu0 %v1974_v17  ;;  %v721_v38 = vld [vmem:[%s2386_s9] sm:$0xff]  ;;  %v722_v41 = vld [vmem:[%s2386_s9 + $0x8] sm:$0xff]  ;;  %s2433_s22 = sld [smem:[#allocation23_spill]] }
  0x33   : > { %s1714_s21 = sshll.u32 %s2173_s19, 4  ;;  %s2434_s2 = sld [smem:[#allocation24_spill]] }
  0x34   : > { %s2435_s6 = sld [smem:[#allocation25_spill]]  ;;  %s716_s27 = scalar_lea.vmem %s2397_s20, %s1714_s21 }
  0x35   : > { %s711_s5 = scalar_lea.vmem %s2431_s29, %s1714_s21  ;;  %s705_s19 = sand.u32 1, %s1959_s25  }
  0x36   : > { %v731_v2 = vld [vmem:[%s711_s5] sm:$0xff]  ;;  %v732_v3 = vld [vmem:[%s711_s5 + $0x8] sm:$0xff]  ;;  %s2436_s5 = sld [smem:[#allocation27_spill]]  ;;  %s706_s30 = scalar_lea.vmem [#allocation8], %s705_s19 }
  0x37   : > { %1682 = vmatmul.msk.f32.vlgmr.msra.gmra.mxu0 %vm733_vm0, %v731_v2  ;;  %v1792_v8 = vld [vmem:[%s2432_s0] ss:$0 sm:$0xff]  ;;  %s2437_s24 = sld [smem:[#allocation26_spill]]  ;;  %s1555_s26 = sshll.u32 %s706_s30, 4  ;;  %s1556_s26 = int_to_ptr.vmem [resolvable:$true] %s1555_s26 }
  0x38   : > { %v857_v42 = vld [vmem:[%s2433_s22 + $0x18] sm:$0xff]  ;;  %v856_v43 = vld [vmem:[%s2433_s22 + $0x10] sm:$0xff]  ;;  %v855_v44 = vld [vmem:[%s2433_s22 + $0x8] sm:$0xff] }
  0x39   : > { %877 = vmatpush.msra.mxu2 %v857_v42  ;;  %v854_v45 = vld [vmem:[%s2433_s22] sm:$0xff] }
  0x3a   : > { %v1793_v58 = vld [vmem:[%s2434_s2] ss:$0 sm:$0xff]  ;;  %s1542_s2 = scalar_lea.sflag [#allocation4], %s705_s19 }
  0x3b   : > { %878 = vmatpush.msra.mxu2 %v856_v43 }
  0x3c   : > { %s1553_s23 = scalar_lea.hbm %s2436_s5, %s2106_s3  ;;  %s1917_s29 = scalar_lea.hbm %s2436_s5, 2 }
  0x3d   : > { %879 = vmatpush.msra.mxu2 %v855_v44  ;;  %s1557_s4 = sshll.u32 %s1553_s23, 4  ;;  %s1558_s4 = int_to_ptr.hbm [resolvable:$true] %s1557_s4 }
  0x3f   : > { %1683 = vmatmul.msk.f32.gmra.mxu0 %vm733_vm0, %v732_v3  ;;  %880 = vmatpush.msra.mxu2 %v854_v45  ;;  %v729_v3 = vld [vmem:[%s2435_s6 + $0x18] sm:$0xff] }
  0x40   : > { %980 = vmatpush.msrb.mxu0 %v729_v3 }
  0xb4   : > { %v757_v4 = vpop.f32.mrf.mxu0 }
  0xbc   : > { %v760_v5 = vpop.f32.mrf.mxu0 }
  0xbd   : > { %786 = vmatpush.msra.mxu1 %v760_v5 }
  0xbf   : > { %787 = vmatpush.msra.mxu1 %v757_v4  ;;  %v728_v4 = vld [vmem:[%s2435_s6 + $0x10] sm:$0xff] }
  0xc0   : > { %1684 = vmatmul.msk.f32.vlgmr.msra.gmra.mxu1 %vm733_vm0, %v2183_v6  ;;  %981 = vmatpush.msrb.mxu0 %v728_v4 }
  0xc8   : > { %1685 = vmatmul.msk.f32.gmra.mxu1 %vm733_vm0, %v2187_v7 }
 0x13d   : > { %v789_v9 = vpop.f32.mrf.mxu1 }
 0x13e   : > { %v790_v10 = vadd.f32 %v1792_v8, %v789_v9 }
 0x140   : > { %v797_v11 = vmul.f32 %v790_v10, %v790_v10  ;;  %v795_v48 = vmax.f32 %v790_v10, 0.0 }
 0x142   : > { %v800_v12 = vsel %vm799_vm1, %v797_v11, 0.0 }
 0x143   : > { %801 = vadd.xlane.f32.xlu0 %v800_v12 }
 0x145   : > { %v792_v13 = vpop.f32.mrf.mxu1 }
 0x146   : > { %v793_v14 = vadd.f32 %v1792_v8, %v792_v13 }
 0x148   : > { %v798_v15 = vmul.f32 %v793_v14, %v793_v14  ;;  %v796_v52 = vmax.f32 %v793_v14, 0.0 }
 0x14a   : > { %v803_v16 = vsel %vm799_vm1, %v798_v15, 0.0 }
 0x14b   : > { %804 = vadd.xlane.f32.xlu0 %v803_v16 }
 0x1b6   : > { %v802_v18 = vpop.xlane.xlu0 %801 }
 0x1b7   : > { %v806_v19 = vmax.f32 %v802_v18, 1e-24 }
 0x1b9   : > { %1795 = vrsqrt.f32 %v806_v19  ;;  %vm814_vm3 = vweird.f32 %v806_v19 }
 0x1be   : > { %v805_v20 = vpop.xlane.xlu0 %804 }
 0x1bf   : > { %v1796_v21 = vpop.eup %1795  ;;  %v807_v22 = vmax.f32 %v805_v20, 1e-24 }
 0x1c0   : > { %v809_v23 = vmul.f32 %v1796_v21, %v806_v19  ;;  %vm815_vm2 = vweird.f32 %v1796_v21 }
 0x1c1   : > { %1797 = vrsqrt.f32 %v807_v22  ;;  %vm816_vm4 = vmor %vm814_vm3, %vm815_vm2  ;;  %vm824_vm5 = vweird.f32 %v807_v22 }
 0x1c2   : > { %v810_v24 = vmul.f32 %v1796_v21, %v809_v23 }
 0x1c4   : > { %v811_v25 = vmul.f32 0.5, %v810_v24 }
 0x1c6   : > { %v812_v26 = vsub.f32 1.5, %v811_v25 }
 0x1c7   : > { %v1798_v27 = vpop.eup %1797 }
 0x1c8   : > { %v819_v28 = vmul.f32 %v1798_v27, %v807_v22  ;;  %v813_v30 = vmul.f32 %v1796_v21, %v812_v26  ;;  %vm825_vm6 = vweird.f32 %v1798_v27 }
 0x1c9   : > { %vm826_vm7 = vmor %vm824_vm5, %vm825_vm6  ;;  %vm1534_vm6 = vcmask 8192  }
 0x1ca   : > { %v820_v31 = vmul.f32 %v1798_v27, %v819_v28  ;;  %v817_v32 = vsel %vm816_vm4, %v1796_v21, %v813_v30  ;;  %v726_v28 = vld [vmem:[%s2435_s6] sm:$0xff] }
 0x1cb   : > { %v828_v33 = vmul.f32 %v817_v32, %v2199_v29 }
 0x1cc   : > { %v821_v34 = vmul.f32 0.5, %v820_v31 }
 0x1cd   : > { %832 = vperm.xlu1 %1789, %v828_v33  }
 0x1ce   : > { %v822_v35 = vsub.f32 1.5, %v821_v34 }
 0x1d0   : > { %v823_v37 = vmul.f32 %v1798_v27, %v822_v35 }
 0x1d2   : > { %v827_v39 = vsel %vm826_vm7, %v1798_v27, %v823_v37  ;;  %v727_v27 = vld [vmem:[%s2435_s6 + $0x8] sm:$0xff] }
 0x1d3   : > { %v829_v40 = vmul.f32 %v827_v39, %v2205_v36  ;;  %982 = vmatpush.msrb.mxu0 %v727_v27  ;;  %v1794_v39 = vld [vmem:[%s2384_s7] ss:$0 sm:$0xff] }
 0x1d5   : > { %844 = vperm.xlu1 %1789, %v721_v38   ;;  %837 = vperm.xlu2 %1790, %v829_v40  }
 0x1d6   : > { %983 = vmatpush.msrb.mxu0 %v726_v28  ;;  %v1443_v28 = vld [vmem:[#allocation7 + $0x78] sm:$0xff] }
 0x1dd   : > { %849 = vperm.xlu2 %1790, %v722_v41  }
 0x22f   : > { %v838_v47 = vpop.permute.xlu2 %837 }
 0x230   : > { %v841_v54 = vmul.f32 %v838_v47, %v796_v52  ;;  %v1079_v47 = vld [vmem:[#allocation7 + $0x8] sm:$0xff]  ;;  %v1261_v52 = vld [vmem:[#allocation7 + $0x40] sm:$0xff] }
 0x231   : > { %1098 = vmatpush.msrb.mxu2 %v1079_v47 }
 0x237   : > { %v2230_v53 = vpop.permute.xlu2 %849 }
 0x238   : > { %v853_v55 = vadd.f32 %v2230_v53, %v841_v54 }
 0x23f   : > { %v833_v46 = vpop.permute.xlu1 %832 }
 0x240   : > { %v840_v49 = vmul.f32 %v833_v46, %v795_v48  ;;  %v1157_v48 = vld [vmem:[#allocation7 + $0x20] sm:$0xff] }
 0x241   : > { %1176 = vmatpush.msra.mxu0 %v1157_v48 }
 0x247   : > { %v2226_v50 = vpop.permute.xlu1 %844 }
 0x248   : > { %v852_v51 = vadd.f32 %v2226_v50, %v840_v49  ;;  %v1183_v49 = vld [vmem:[#allocation7 + $0x28] sm:$0xff] }
 0x24a   : > { %1686 = vmatmul.msk.f32.vlgmr.msra.gmra.mxu2 %vm799_vm1, %v852_v51  ;;  %v1131_v51 = vld [vmem:[#allocation7 + $0x18] sm:$0xff] }
 0x24b   : > { %1150 = vmatpush.msra.mxu2 %v1131_v51 }
 0x252   : > { %1687 = vmatmul.msk.f32.gmra.mxu2 %vm799_vm1, %v853_v55 }
 0x2cd   : > { %v882_v56 = vpop.f32.mrf.mxu2 }
 0x2d5   : > { %v885_v57 = vpop.f32.mrf.mxu2 }
 0x2d6   : > { %905 = vmatpush.msra.mxu3 %v885_v57 }
 0x2d8   : > { %906 = vmatpush.msra.mxu3 %v882_v56 }
 0x2d9   : > { %1688 = vmatmul.msk.f32.vlgmr.msra.gmra.mxu3 %vm733_vm0, %v2183_v6 }
 0x2e1   : > { %1689 = vmatmul.msk.f32.gmra.mxu3 %vm733_vm0, %v2187_v7 }
 0x35c   : > { %v908_v59 = vpop.f32.mrf.mxu3 }
 0x35d   : > { %v909_v60 = vadd.f32 %v1793_v58, %v908_v59 }
 0x35f   : > { %v916_v61 = vmul.f32 %v909_v60, %v909_v60 }
 0x361   : > { %v918_v62 = vsel %vm799_vm1, %v916_v61, 0.0 }
 0x362   : > { %919 = vadd.xlane.f32.xlu0 %v918_v62 }
 0x364   : > { %v911_v63 = vpop.f32.mrf.mxu3 }
 0x365   : > { %v912_v0 = vadd.f32 %v1793_v58, %v911_v63 }
 0x367   : > { %v917_v1 = vmul.f32 %v912_v0, %v912_v0  ;;  %v915_v33 = vmax.f32 %v912_v0, 0.0 }
 0x369   : > { %v921_v2 = vsel %vm799_vm1, %v917_v1, 0.0 }
 0x36a   : > { %922 = vadd.xlane.f32.xlu1 %v921_v2 }
 0x3d5   : > { %v920_v5 = vpop.xlane.xlu0 %919 }
 0x3d6   : > { %v924_v8 = vmax.f32 %v920_v5, 1e-24  ;;  %v1209_v5 = vld [vmem:[#allocation7 + $0x30] sm:$0xff] }
 0x3d8   : > { %1799 = vrsqrt.f32 %v924_v8  ;;  %vm932_vm9 = vweird.f32 %v924_v8 }
 0x3dd   : > { %v923_v9 = vpop.xlane.xlu1 %922 }
 0x3de   : > { %v1800_v10 = vpop.eup %1799  ;;  %v925_v11 = vmax.f32 %v923_v9, 1e-24 }
 0x3df   : > { %v927_v12 = vmul.f32 %v1800_v10, %v924_v8  ;;  %vm933_vm8 = vweird.f32 %v1800_v10 }
 0x3e0   : > { %1801 = vrsqrt.f32 %v925_v11  ;;  %vm934_vm10 = vmor %vm932_vm9, %vm933_vm8  ;;  %vm942_vm12 = vweird.f32 %v925_v11 }
 0x3e1   : > { %v928_v13 = vmul.f32 %v1800_v10, %v927_v12  ;;  %v1235_v12 = vld [vmem:[#allocation7 + $0x38] sm:$0xff] }
 0x3e3   : > { %v929_v14 = vmul.f32 0.5, %v928_v13 }
 0x3e5   : > { %v930_v15 = vsub.f32 1.5, %v929_v14  ;;  %v1365_v14 = vld [vmem:[#allocation7 + $0x60] sm:$0xff] }
 0x3e6   : > { %v1802_v16 = vpop.eup %1801 }
 0x3e7   : > { %v937_v17 = vmul.f32 %v1802_v16, %v925_v11  ;;  %v931_v18 = vmul.f32 %v1800_v10, %v930_v15  ;;  %vm943_vm11 = vweird.f32 %v1802_v16  ;;  %v1391_v15 = vld [vmem:[#allocation7 + $0x68] sm:$0xff] }
 0x3e8   : > { %vm944_vm13 = vmor %vm942_vm12, %vm943_vm11 }
 0x3e9   : > { %v938_v19 = vmul.f32 %v1802_v16, %v937_v17  ;;  %v935_v20 = vsel %vm934_vm10, %v1800_v10, %v931_v18 }
 0x3ea   : > { %v946_v21 = vmul.f32 %v935_v20, %v2199_v29  ;;  %v914_v29 = vmax.f32 %v909_v60, 0.0  ;;  %v1313_v20 = vld [vmem:[#allocation7 + $0x50] sm:$0xff] }
 0x3eb   : > { %v939_v22 = vmul.f32 0.5, %v938_v19 }
 0x3ec   : > { %950 = vperm.xlu2 %1790, %v946_v21  }
 0x3ed   : > { %v940_v23 = vsub.f32 1.5, %v939_v22 }
 0x3ef   : > { %v941_v24 = vmul.f32 %v1802_v16, %v940_v23  ;;  %v1339_v23 = vld [vmem:[#allocation7 + $0x58] sm:$0xff] }
 0x3f1   : > { %v945_v25 = vsel %vm944_vm13, %v1802_v16, %v941_v24 }
 0x3f2   : > { %v947_v26 = vmul.f32 %v945_v25, %v2205_v36  ;;  %v1417_v25 = vld [vmem:[#allocation7 + $0x70] sm:$0xff] }
 0x3f4   : > { %955 = vperm.xlu0 %1791, %v947_v26  }
 0x446   : > { %v951_v30 = vpop.permute.xlu2 %950 }
 0x447   : > { %v958_v31 = vmul.f32 %v951_v30, %v914_v29 }
 0x449   : > { %v960_v32 = vadd.f32 %v958_v31, %v2226_v50  ;;  %v1105_v50 = vld [vmem:[#allocation7 + $0x10] sm:$0xff] }
 0x44b   : > { %1690 = vmatmul.msk.f32.vlgmr.msrb.gmra.mxu0 %vm799_vm1, %v960_v32 }
 0x44c   : > { %1280 = vmatpush.msrb.mxu0 %v1261_v52 }
 0x466   : > { %v956_v34 = vpop.permute.xlu0 %955 }
 0x467   : > { %v959_v35 = vmul.f32 %v956_v34, %v915_v33  ;;  %v1052_v34 = vld [vmem:[%s2388_s11] sm:$0x1] }
 0x469   : > { %v961_v36 = vadd.f32 %v959_v35, %v2230_v53  ;;  %v1287_v53 = vld [vmem:[#allocation7 + $0x48] sm:$0xff] }
 0x46b   : > { %1691 = vmatmul.msk.f32.gmra.mxu0 %vm799_vm1, %v961_v36 }
 0x4c8   : > { %v985_v37 = vpop.f32.mrf.mxu0 }
 0x4e8   : > { %v988_v38 = vpop.f32.mrf.mxu0 }
 0x4e9   : > { %1008 = vmatpush.msrb.mxu1 %v988_v38  ;;  %v1476_v38 = vld [vmem:[%s2391_s14 + $0x18] sm:$0xff] }
 0x4eb   : > { %1009 = vmatpush.msrb.mxu1 %v985_v37 }
 0x4ec   : > { %1692 = vmatmul.msk.f32.vlgmr.msrb.gmra.mxu1 %vm733_vm0, %v2183_v6 }
 0x4ed   : > { %1202 = vmatpush.msra.mxu1 %v1183_v49 }
 0x4ef   : > { %1306 = vmatpush.msrb.mxu1 %v1287_v53 }
 0x4f4   : > { %1693 = vmatmul.msk.f32.gmra.mxu1 %vm733_vm0, %v2187_v7  ;;  %v1053_v7 = vld [vmem:[#allocation7] sm:$0xff] }
 0x4f5   : > { %1072 = vmatpush.msrb.mxu3 %v1053_v7 }
 0x4f7   : > { %1124 = vmatpush.msra.mxu3 %v1105_v50 }
 0x569   : > { %v1011_v40 = vpop.f32.mrf.mxu1 }
 0x56a   : > { %v1012_v41 = vadd.f32 %v1794_v39, %v1011_v40 }
 0x56c   : > { %v1017_v42 = vmul.f32 %v1012_v41, %v1012_v41 }
 0x56e   : > { %v1020_v43 = vsel %vm1019_vm14, %v1017_v42, 0.0 }
 0x56f   : > { %1021 = vadd.xlane.f32.xlu2 %v1020_v43  ;;  %v1474_v43 = vld [vmem:[%s2391_s14 + $0x8] sm:$0xff] }
 0x571   : > { %v1014_v44 = vpop.f32.mrf.mxu1 }
 0x572   : > { %v2269_v45 = vadd.f32 %v1794_v39, %v1014_v44  ;;  %v1475_v39 = vld [vmem:[%s2391_s14 + $0x10] sm:$0xff] }
 0x574   : > { %v1018_v6 = vmul.f32 %v2269_v45, %v2269_v45 }
 0x576   : > { %v1023_v46 = vsel %vm1019_vm14, %v1018_v6, 0.0 }
 0x577   : > { %1024 = vadd.xlane.f32.xlu1 %v1023_v46 }
 0x5e2   : > { %v1022_v54 = vpop.xlane.xlu2 %1021 }
 0x5e3   : > { %v1026_v55 = vmax.f32 %v1022_v54, 1e-24 }
 0x5e5   : > { %1803 = vrsqrt.f32 %v1026_v55  ;;  %vm1034_vm0 = vweird.f32 %v1026_v55 }
 0x5ea   : > { %v1025_v56 = vpop.xlane.xlu1 %1024 }
 0x5eb   : > { %v1804_v57 = vpop.eup %1803  ;;  %v1027_v58 = vmax.f32 %v1025_v56, 1e-24 }
 0x5ec   : > { %v1029_v59 = vmul.f32 %v1804_v57, %v1026_v55  ;;  %vm1035_vm15 = vweird.f32 %v1804_v57 }
 0x5ed   : > { %1805 = vrsqrt.f32 %v1027_v58  ;;  %vm1036_vm2 = vmor %vm1034_vm0, %vm1035_vm15  ;;  %vm1044_vm3 = vweird.f32 %v1027_v58 }
 0x5ee   : > { %v1030_v60 = vmul.f32 %v1804_v57, %v1029_v59 }
 0x5f0   : > { %v1031_v61 = vmul.f32 0.5, %v1030_v60 }
 0x5f2   : > { %v1032_v62 = vsub.f32 1.5, %v1031_v61 }
 0x5f3   : > { %v1806_v63 = vpop.eup %1805 }
 0x5f4   : > { %v1033_v0 = vmul.f32 %v1804_v57, %v1032_v62  ;;  %v1039_v1 = vmul.f32 %v1806_v63, %v1027_v58  ;;  %vm1045_vm4 = vweird.f32 %v1806_v63 }
 0x5f5   : > { %vm1046_vm5 = vmor %vm1044_vm3, %vm1045_vm4 }
 0x5f6   : > { %v1037_v2 = vsel %vm1036_vm2, %v1804_v57, %v1033_v0  ;;  %v1040_v3 = vmul.f32 %v1806_v63, %v1039_v1 }
 0x5f7   : > { %v1048_v4 = vmul.f32 %v1037_v2, %v1012_v41 }
 0x5f8   : > { %v1041_v8 = vmul.f32 0.5, %v1040_v3 }
 0x5f9   : > { %1050 = vst.msk [vmem:[%s716_s27] sm:$0xff] %vm1019_vm14, %v1048_v4  ;;  %1694 = vmatmul.msk.f32.vlgmr.msrb.gmra.mxu3 %vm1019_vm14, %v1048_v4  ;;  %v1080_v9 = vrot.slane %v1048_v4, 1  ;;  %v1158_v10 = vrot.slane %v1048_v4, 4  ;;  %v1184_v11 = vrot.slane %v1048_v4, 5  ;;  %v1106_v19 = vrot.slane %v1048_v4, 2 }
 0x5fa   : > { %v1042_v13 = vsub.f32 1.5, %v1041_v8  ;;  %1228 = vmatpush.msrb.mxu3 %v1209_v5  ;;  %v1132_v21 = vrot.slane %v1048_v4, 3  ;;  %v1210_v24 = vrot.slane %v1048_v4, 6  ;;  %v1236_v26 = vrot.slane %v1048_v4, 7  ;;  %v1469_v5 = vld [vmem:[%s2389_s12] sm:$0x1] }
 0x5fb   : > { %1695 = vmatmul.msk.f32.vlgmr.msrb.gmra.mxu2 %vm1019_vm14, %v1080_v9  ;;  %1698 = vmatmul.msk.f32.vlgmr.msra.gmra.mxu0 %vm1019_vm14, %v1158_v10  ;;  %v1471_v9 = vld [vmem:[%s2390_s13] sm:$0x1] }
 0x5fc   : > { %v1043_v16 = vmul.f32 %v1806_v63, %v1042_v13  ;;  %1699 = vmatmul.msk.f32.vlgmr.msra.gmra.mxu1 %vm1019_vm14, %v1184_v11  ;;  %1254 = vmatpush.msrb.mxu2 %v1235_v12  ;;  %v1509_v12 = vld [vmem:[%s2395_s18 + $0x18] sm:$0xff]  ;;  %v1508_v13 = vld [vmem:[%s2395_s18 + $0x10] sm:$0xff] }
 0x5fd   : > { %1384 = vmatpush.msra.mxu0 %v1365_v14  ;;  %1410 = vmatpush.msra.mxu1 %v1391_v15  ;;  %v1507_v14 = vld [vmem:[%s2395_s18 + $0x8] sm:$0xff]  ;;  %v1506_v15 = vld [vmem:[%s2395_s18] sm:$0xff] }
 0x5fe   : > { %v1047_v17 = vsel %vm1046_vm5, %v1806_v63, %v1043_v16  ;;  %v1477_v16 = vld [vmem:[%s2392_s15] sm:$0x1] }
 0x5ff   : > { %v1049_v18 = vmul.f32 %v1047_v17, %v2269_v45  ;;  %v1473_v45 = vld [vmem:[%s2391_s14] sm:$0xff] }
 0x601   : > { %1051 = vst.msk [vmem:[%s716_s27 + $0x8] sm:$0xff] %vm1019_vm14, %v1049_v18  ;;  %1696 = vmatmul.msk.f32.vlgmr.msra.gmra.mxu3 %vm1019_vm14, %v1106_v19  ;;  %v1288_v22 = vrot.slane %v1049_v18, 1  ;;  %v1366_v27 = vrot.slane %v1049_v18, 4  ;;  %v1392_v29 = vrot.slane %v1049_v18, 5  ;;  %v1314_v30 = vrot.slane %v1049_v18, 2  ;;  %s1911_s27 = sshra.s32 %s1558_s4, 4  ;;  %s1912_s27 = int_to_ptr.hbm [resolvable:$true] %s1911_s27 }
 0x602   : > { %1332 = vmatpush.msra.mxu3 %v1313_v20  ;;  %v1340_v31 = vrot.slane %v1049_v18, 3  ;;  %v1418_v32 = vrot.slane %v1049_v18, 6  ;;  %v1444_v33 = vrot.slane %v1049_v18, 7  ;;  %v1502_v19 = vld [vmem:[%s2393_s16] sm:$0x1]  ;;  %s1913_s6 = scalar_lea.hbm %s1912_s27, 1  ;;  %p1918_p3 = scmp.lt.s32.totalorder %s1912_s27, %s2436_s5 }
 0x603   : > { %1697 = vmatmul.msk.f32.vlgmr.msra.gmra.mxu2 %vm1019_vm14, %v1132_v21  ;;  %1702 = vmatmul.msk.f32.vlgmr.msrb.gmra.mxu0 %vm1019_vm14, %v1049_v18  ;;  %v1504_v21 = vld [vmem:[%s2394_s17] sm:$0x1]  ;;  %p1914_p0 = scmp.ne.s32.totalorder %s1912_s27, %s1913_s6  ;;  %p1919_p4 = scmp.lt.s32.totalorder %s1917_s29, %s1913_s6 }
 0x604   : > { %1703 = vmatmul.msk.f32.vlgmr.msrb.gmra.mxu1 %vm1019_vm14, %v1288_v22  ;;  %1358 = vmatpush.msra.mxu2 %v1339_v23 }
 0x605   : > { %1493 = vmatpush.msrb.mxu0 %v1476_v38  ;;  %1526 = vmatpush.msrb.mxu1 %v1509_v12  ;;  %p1915_p1 = pnand %p1914_p0, %p2123_p5  ;;  %p1920_p7 = por %p1919_p4, %p1918_p3 }
 0x607   : > { %1494 = vmatpush.msrb.mxu0 %v1475_v39  ;;  %1527 = vmatpush.msrb.mxu1 %v1508_v13  ;;  %p1916_p2 = pneg %p1915_p1 }
 0x609   : > { %1700 = vmatmul.msk.f32.vlgmr.msrb.gmra.mxu3 %vm1019_vm14, %v1210_v24  ;;  %1495 = vmatpush.msrb.mxu0 %v1474_v43  ;;  %v1510_v24 = vld [vmem:[%s2437_s24] sm:$0x1]  ;;  %p1921_p8 = pnand %p1920_p7, %p1916_p2 }
 0x60a   : > { %1436 = vmatpush.msrb.mxu3 %v1417_v25  ;;  %1528 = vmatpush.msrb.mxu1 %v1507_v14 }
 0x60b   : > { %1701 = vmatmul.msk.f32.vlgmr.msrb.gmra.mxu2 %vm1019_vm14, %v1236_v26  ;;  %1706 = vmatmul.msk.f32.vlgmr.msra.gmra.mxu0 %vm1019_vm14, %v1366_v27 }
 0x60c   : > { %1707 = vmatmul.msk.f32.vlgmr.msra.gmra.mxu1 %vm1019_vm14, %v1392_v29  ;;  %1462 = vmatpush.msrb.mxu2 %v1443_v28 }
 0x60d   : > { %1496 = vmatpush.msrb.mxu0 %v1473_v45  ;;  %1529 = vmatpush.msrb.mxu1 %v1506_v15 }
 0x611   : > { %1704 = vmatmul.msk.f32.vlgmr.msra.gmra.mxu3 %vm1019_vm14, %v1314_v30 }
 0x613   : > { %1705 = vmatmul.msk.f32.vlgmr.msra.gmra.mxu2 %vm1019_vm14, %v1340_v31 }
 0x619   : > { %1708 = vmatmul.msk.f32.vlgmr.msrb.gmra.mxu3 %vm1019_vm14, %v1418_v32 }
 0x61b   : > { %1709 = vmatmul.msk.f32.vlgmr.msrb.gmra.mxu2 %vm1019_vm14, %v1444_v33 }
 0x678   : > { %v1178_v41 = vpop.f32.mrf.mxu0 }
 0x679   : > { %v1204_v6 = vpop.f32.mrf.mxu1 }
 0x67c   : > { %v1074_v35 = vpop.f32.mrf.mxu3 }
 0x67d   : > { %v1077_v37 = vadd.f32 %v1074_v35, %v1052_v34 }
 0x67e   : > { %v1100_v36 = vpop.f32.mrf.mxu2 }
 0x67f   : > { %v1103_v40 = vadd.f32 %v1100_v36, %v1077_v37 }
 0x680   : > { %v1282_v51 = vpop.f32.mrf.mxu0 }
 0x681   : > { %v1308_v54 = vpop.f32.mrf.mxu1 }
 0x684   : > { %v1126_v42 = vpop.f32.mrf.mxu3 }
 0x685   : > { %v1129_v44 = vadd.f32 %v1126_v42, %v1103_v40 }
 0x686   : > { %v1152_v46 = vpop.f32.mrf.mxu2 }
 0x687   : > { %v1155_v7 = vadd.f32 %v1152_v46, %v1129_v44 }
 0x688   : > { %v1386_v61 = vpop.f32.mrf.mxu0 }
 0x689   : > { %v1181_v47 = vadd.f32 %v1178_v41, %v1155_v7  ;;  %v1412_v63 = vpop.f32.mrf.mxu1 }
 0x68b   : > { %v1207_v48 = vadd.f32 %v1204_v6, %v1181_v47 }
 0x68c   : > { %v1230_v49 = vpop.f32.mrf.mxu3 }
 0x68d   : > { %v1233_v50 = vadd.f32 %v1230_v49, %v1207_v48 }
 0x68e   : > { %v1256_v52 = vpop.f32.mrf.mxu2 }
 0x68f   : > { %v1259_v53 = vadd.f32 %v1256_v52, %v1233_v50 }
 0x691   : > { %v1285_v55 = vadd.f32 %v1282_v51, %v1259_v53 }
 0x693   : > { %v1311_v56 = vadd.f32 %v1308_v54, %v1285_v55 }
 0x694   : > { %v1334_v57 = vpop.f32.mrf.mxu3 }
 0x695   : > { %v1337_v58 = vadd.f32 %v1334_v57, %v1311_v56 }
 0x696   : > { %v1360_v59 = vpop.f32.mrf.mxu2 }
 0x697   : > { %v1363_v60 = vadd.f32 %v1360_v59, %v1337_v58 }
 0x699   : > { %v1389_v62 = vadd.f32 %v1386_v61, %v1363_v60 }
 0x69b   : > { %v1415_v0 = vadd.f32 %v1412_v63, %v1389_v62 }
 0x69c   : > { %v1438_v1 = vpop.f32.mrf.mxu3 }
 0x69d   : > { %v1441_v2 = vadd.f32 %v1438_v1, %v1415_v0 }
 0x69e   : > { %v1464_v3 = vpop.f32.mrf.mxu2 }
 0x69f   : > { %v1467_v4 = vadd.f32 %v1464_v3, %v1441_v2 }
 0x6a1   : > { %v1468_v8 = vmax.f32 %v1467_v4, 0.0 }
 0x6a3   : > { %v1470_v10 = vmul.f32 %v1469_v5, %v1468_v8 }
 0x6a5   : > { %v1472_v11 = vadd.f32 %v1471_v9, %v1470_v10 }
 0x6a7   : > { %1710 = vmatmul.msk.f32.vlgmr.msrb.gmra.mxu0 %vm799_vm1, %v1472_v11 }
 0x724   : > { %v1498_v17 = vpop.f32.mrf.mxu0 }
 0x725   : > { %v1499_v18 = vadd.f32 %v1498_v17, %v1477_v16 }
 0x727   : > { %v1501_v20 = vmax.f32 %v1499_v18, 0.0 }
 0x729   : > { %v1503_v22 = vmul.f32 %v1502_v19, %v1501_v20 }
 0x72b   : > { %v1505_v23 = vadd.f32 %v1504_v21, %v1503_v22 }
 0x72d   : > { %1711 = vmatmul.msk.f32.vlgmr.msrb.gmra.mxu1 %vm799_vm1, %v1505_v23 }
 0x7aa   : > { %v1531_v25 = vpop.f32.mrf.mxu1 }
 0x7ab   : > { %v1532_v26 = vadd.f32 %v1531_v25, %v1510_v24 }
 0x7ad   : > { %1535 = vst.msk [vmem:[%s706_s30] sm:$0x1] %vm1534_vm6, %v1532_v26 }
 0x7ae   : > { %1924 = shalt.err (!%p1921_p8)
}
 0x7af   : > { %1728 = dma.vmem_to_hbm [thread:$0]  (%p2123_p5), %s1556_s26, 16, %s1558_s4, %s1542_s2  }
 0x7b0 PF: > { %s2439_s19 = sld [smem:[#allocation14_spill]] }
 0x7b1   : > { %s2440_s1 = sld [smem:[#allocation12_spill]] }
 0x7b6   : > { %p1750_p9 = scmp.ge.s32.totalorder %s2439_s19, 2 }
 0x7b7   : > { %s1577_s30 = sand.u32 1, %s2440_s1  }
 0x7b8   : > { %p1741_p10 = pnand %p1750_p9, %p2127_p6  ;;  %s1578_s3 = scalar_lea.sflag [#allocation4], %s1577_s30 }
 0x7ba   : > { %p1742_p11 = pneg %p1741_p10 }
 0x7bc   : > { %1950 = dma.done.wait (%p1742_p11), %s1578_s3, 16  }
 0x7bd   : > { %1952 = vsyncadd (%p1742_p11), %s1578_s3, 4294967280  ;;  %s2442_s27 = sld [smem:[#allocation15_spill]]  ;;  %s2445_s2 = smov %s1959_s25 }
 0x7be   : > { %s2443_s6 = sld [smem:[#allocation13_spill]] }
 0x7bf   : > { %s2444_s26 = sld [smem:[#allocation16_spill]] }
 0x7c3   : > { %p34_p12 = scmp.ge.s32.totalorder %s2442_s27, 4  }
 0x7c4   : > { %s2446_s25 = smov %s2443_s6 }
 0x7c5   :  { %36 = sbr.rel (!%p34_p12) target bundleno = 15 (0xf), region = 175 }
 0x7ca   :  { %1583 = vsyncpa [#allocation3], 1 }
 0x7cb   :  { %1585 = vsyncpa [#allocation3 + $0x1], 1 }
 0x7cc   :  { %1586 = vsyncpa [#allocation6], 1 }
 0x7cd   :  { %1587 = vsyncpa [#allocation4], 1 }
 0x7ce   :  { %1589 = vsyncpa [#allocation4 + $0x1], 1 }

</bundles_post_ra>
